<compile_context>
chip_gen: v7x
topology: tpu7x:2x2x1
jax: 0.10.0
libtpu: 0.0.40
codegen_flags: <defaults>
</compile_context>

<pallas_src>
import functools

import jax
import jax.numpy as jnp
from jax import lax
from jax.experimental import pallas as pl
from jax.experimental.pallas import tpu as pltpu


def _round_up(v, m):
    return ((v + m - 1) // m) * m


def _gru_head_kernel(h0_ref, x_ref,
                     w_ih_ref, w_hh_ref, b_proj_ref, bhn_ref,
                     w1_ref, b1_ref, w2_ref, b2_ref,
                     out_ref,
                     h_acc, g_sc,
                     *, num_classes, hp, t_real, t_blk, pad_t, unroll):
    """One (batch-tile, time-chunk) grid step of the GRU recurrence
    (+ MLP head / softmax on the last time chunk).

    h0_ref : (bt, Hp)       f32   initial hidden state (zero-padded lanes)
    x_ref  : (Tb, bt, I)    bf16  time-major input chunk
    w_ih   : (I, 3*Hp)      bf16  fused input weights  [r | z | n]
    w_hh   : (Hp, 3*Hp)     bf16  fused hidden weights [r | z | n]
    b_proj : (1, 3*Hp)      f32   [b_ih_r+b_hh_r | b_ih_z+b_hh_z | b_ih_n]
    bhn    : (1, Hp)        f32   b_hh_n (must stay inside r * (...))
    w1     : (Hp, H2p)      bf16  fc1 weight (transposed, padded)
    b1     : (1, H2p)       f32
    w2     : (H2p, Cp)      bf16  fc_out weight (transposed, lane-padded)
    b2     : (1, Cp)        f32
    out_ref: (bt, Cp)       f32   softmax probabilities (padded lanes 0)
    h_acc  : (bt, Hp)       f32   VMEM scratch carrying h across time chunks
    g_sc   : (Tb*bt, 3*Hp)  f32   VMEM scratch: hoisted input projection
    """
    tc = pl.program_id(1)
    n_tc = pl.num_programs(1)
    bt = h0_ref.shape[0]

    @pl.when(tc == 0)
    def _():
        h_acc[...] = h0_ref[...]

    # ---- hoisted input projection: one fused MXU matmul for the chunk ----
    # Time-major layout => the per-step reads below are contiguous aligned
    # (bt, 3Hp) tiles, not strided sublane gathers.
    x2d = x_ref[...].reshape(t_blk * bt, x_ref.shape[-1])
    g_sc[...] = (jnp.dot(x2d, w_ih_ref[...],
                         preferred_element_type=jnp.float32)
                 + b_proj_ref[...])

    whh = w_hh_ref[...]                                   # hoisted weight load
    bhn = jnp.broadcast_to(bhn_ref[...], (bt, hp))        # hoisted (no CSE in loops)

    # ---- serial recurrence: ONE fused (bt,Hp)x(Hp,3Hp) MXU push per step ----
    def step(t, h):
        off = pl.multiple_of(t * bt, bt)
        gt = g_sc[pl.ds(off, bt), :]                      # (bt, 3Hp) f32, aligned
        gh = jnp.dot(h.astype(jnp.bfloat16), whh,
                     preferred_element_type=jnp.float32)  # (bt, 3Hp) f32
        r = jax.nn.sigmoid(gt[:, 0:hp] + gh[:, 0:hp])
        z = jax.nn.sigmoid(gt[:, hp:2 * hp] + gh[:, hp:2 * hp])
        n = jnp.tanh(gt[:, 2 * hp:3 * hp] + r * (gh[:, 2 * hp:3 * hp] + bhn))
        h_new = n + z * (h - n)                           # == (1-z)*n + z*h
        if pad_t:
            # Padded timesteps (global step >= real T) leave h unchanged.
            valid = (tc * t_blk + t) < t_real
            h_new = jnp.where(valid, h_new, h)
        return h_new

    h = lax.fori_loop(0, t_blk, step, h_acc[...], unroll=unroll)
    h_acc[...] = h

    # ---- MLP head + masked softmax, only on the final time chunk ----
    # The out block index is constant along the time axis, so it is written
    # back exactly once (after this write) under Pallas revisit semantics.
    @pl.when(tc == n_tc - 1)
    def _():
        hb = h.astype(jnp.bfloat16)
        y = jnp.dot(hb, w1_ref[...],
                    preferred_element_type=jnp.float32) + b1_ref[...]
        y = jnp.maximum(y, 0.0)
        logits = jnp.dot(y.astype(jnp.bfloat16), w2_ref[...],
                         preferred_element_type=jnp.float32) + b2_ref[...]
        logits = jnp.maximum(logits, 0.0)
        # Mask the lane padding so softmax only spans the real classes.
        col = lax.broadcasted_iota(jnp.int32, logits.shape, 1)
        logits = jnp.where(col < num_classes, logits, -1e30)
        m = jnp.max(logits, axis=-1, keepdims=True)
        e = jnp.exp(logits - m)
        inv = pl.reciprocal(jnp.sum(e, axis=-1, keepdims=True), approx=True)
        out_ref[...] = e * inv


def _pick_time_block(T, bt, hp, input_size):
    """Largest time chunk (multiple of 8, divides padded T) within a VMEM
    streaming budget safe for v7x (64 MiB physical)."""
    t_pad = _round_up(T, 8)
    budget = 24 * 1024 * 1024
    for cand in (128, 64, 32, 16, 8):
        if cand > t_pad or t_pad % cand != 0:
            continue
        stream = cand * bt * 3 * hp * 4 + 2 * cand * bt * input_size * 2
        if stream <= budget:
            return cand, t_pad
    return 8, t_pad


@jax.jit
def rnn_forward(x, hidden, params):
    """x: (B, T, I), hidden: (1, B, H). Returns (1, B, C) like the PyTorch module."""
    B, T, I = x.shape
    H = hidden.shape[-1]
    w_ih, w_hh, b_ih, b_hh, w1, b1, w2, b2 = params
    H2 = w1.shape[0]
    C = w2.shape[0]

    f32, bf16 = jnp.float32, jnp.bfloat16

    # Padded dims: lane-aligned gate width, fc widths, sublane-aligned batch.
    Hp = _round_up(H, 128)
    H2p = _round_up(H2, 128)
    Cp = _round_up(C, 128)
    Bp = _round_up(B, 8)

    # Batch tiling: two tiles when possible so v7x's second TC gets a slice.
    bt = Bp // 2 if Bp % 16 == 0 else Bp
    n_bt = Bp // bt

    # ---- fused, gate-padded weights (torch GRU gate order: r, z, n) ----
    w_ih_f = jnp.zeros((I, 3 * Hp), bf16)
    w_hh_f = jnp.zeros((Hp, 3 * Hp), bf16)
    for g in range(3):
        w_ih_f = w_ih_f.at[:, g * Hp:g * Hp + H].set(
            w_ih[g * H:(g + 1) * H].T.astype(bf16))
        w_hh_f = w_hh_f.at[:H, g * Hp:g * Hp + H].set(
            w_hh[g * H:(g + 1) * H].T.astype(bf16))

    b_proj = jnp.zeros((1, 3 * Hp), f32)
    b_proj = b_proj.at[0, 0 * Hp:0 * Hp + H].set(b_ih[0:H] + b_hh[0:H])
    b_proj = b_proj.at[0, 1 * Hp:1 * Hp + H].set(b_ih[H:2 * H] + b_hh[H:2 * H])
    b_proj = b_proj.at[0, 2 * Hp:2 * Hp + H].set(b_ih[2 * H:3 * H])
    bhn = jnp.zeros((1, Hp), f32).at[0, :H].set(b_hh[2 * H:3 * H])

    w1t = jnp.zeros((Hp, H2p), bf16).at[:H, :H2].set(w1.T.astype(bf16))
    b1r = jnp.zeros((1, H2p), f32).at[0, :H2].set(b1.astype(f32))
    w2t = jnp.zeros((H2p, Cp), bf16).at[:H2, :C].set(w2.T.astype(bf16))
    b2r = jnp.zeros((1, Cp), f32).at[0, :C].set(b2.astype(f32))

    # ---- padded, time-major input and padded initial hidden state ----
    t_blk, T_pad = _pick_time_block(T, bt, Hp, I)
    n_tc = T_pad // t_blk
    x_p = jnp.zeros((Bp, T_pad, I), bf16).at[:B, :T, :].set(x.astype(bf16))
    x_tm = jnp.transpose(x_p, (1, 0, 2))                  # (T_pad, Bp, I)
    h0_p = jnp.zeros((Bp, Hp), f32).at[:B, :H].set(hidden[0].astype(f32))

    def full_spec(a):
        nd = a.ndim
        return pl.BlockSpec(a.shape, lambda b, t, _nd=nd: (0,) * _nd)

    args = (h0_p, x_tm, w_ih_f, w_hh_f, b_proj, bhn, w1t, b1r, w2t, b2r)
    in_specs = [
        pl.BlockSpec((bt, Hp), lambda b, t: (b, 0)),           # h0 per batch tile
        pl.BlockSpec((t_blk, bt, I), lambda b, t: (t, b, 0)),  # stream x over time
        full_spec(w_ih_f), full_spec(w_hh_f), full_spec(b_proj), full_spec(bhn),
        full_spec(w1t), full_spec(b1r), full_spec(w2t), full_spec(b2r),
    ]
    out_spec = pl.BlockSpec((bt, Cp), lambda b, t: (b, 0))

    # VMEM budget: default double-buffered weights + streaming x/gate slabs.
    weight_bytes = (w_ih_f.size + w_hh_f.size + w1t.size + w2t.size) * 2
    bias_bytes = (b_proj.size + bhn.size + b1r.size + b2r.size) * 4
    stream_bytes = 2 * (t_blk * bt * I * 2) + t_blk * bt * 3 * Hp * 4
    state_bytes = 3 * bt * Hp * 4 + 2 * bt * Cp * 4
    est = 2 * (weight_bytes + bias_bytes) + stream_bytes + state_bytes
    vmem_limit = int(min(100 * 2**20, max(32 * 2**20, int(1.5 * est) + 2 * 2**20)))

    kernel = functools.partial(
        _gru_head_kernel,
        num_classes=C, hp=Hp, t_real=T, t_blk=t_blk,
        pad_t=(T_pad != T), unroll=(t_blk if t_blk <= 8 else 8))

    out_padded = pl.pallas_call(
        kernel,
        out_shape=jax.ShapeDtypeStruct((Bp, Cp), jnp.float32),
        grid_spec=pltpu.PrefetchScalarGridSpec(
            num_scalar_prefetch=0,
            grid=(n_bt, n_tc),
            in_specs=in_specs,
            out_specs=out_spec,
            scratch_shapes=[
                pltpu.VMEM((bt, Hp), jnp.float32),             # h carry
                pltpu.VMEM((t_blk * bt, 3 * Hp), jnp.float32),  # gate projections
            ],
        ),
        compiler_params=pltpu.CompilerParams(
            # batch tiles are independent (megacore); time is a carried recurrence
            dimension_semantics=("parallel", "arbitrary"),
            vmem_limit_bytes=vmem_limit,
        ),
    )(*args)

    return out_padded[:B, :C][None, :, :]                 # (1, B, C)


def _reference_forward(x, hidden, params):
    """Pure-JAX f32 reference matching torch.nn.GRU (gate order r,z,n) semantics."""
    w_ih, w_hh, b_ih, b_hh, w1, b1, w2, b2 = params
    H = hidden.shape[-1]
    h = hidden[0]
    B, T, _ = x.shape
    for t in range(T):
        gx = x[:, t, :] @ w_ih.T + b_ih
        gh = h @ w_hh.T + b_hh
        r = jax.nn.sigmoid(gx[:, :H] + gh[:, :H])
        z = jax.nn.sigmoid(gx[:, H:2 * H] + gh[:, H:2 * H])
        n = jnp.tanh(gx[:, 2 * H:] + r * gh[:, 2 * H:])
        h = (1.0 - z) * n + z * h
    y = jnp.maximum(h @ w1.T + b1, 0.0)
    logits = jnp.maximum(y @ w2.T + b2, 0.0)
    return jax.nn.softmax(logits, axis=-1)[None]


if __name__ == "__main__":
    # Small shapes consistent with the module's forward.
    B, T, I, H, C = 2, 8, 16, 32, 4
    H2 = H // 2

    key = jax.random.PRNGKey(0)
    ks = jax.random.split(key, 10)

    # Deterministic parameter init (shapes follow nn.GRU / nn.Linear).
    s = 1.0 / jnp.sqrt(H)
    w_ih = jax.random.uniform(ks[0], (3 * H, I), jnp.float32, -s, s)
    w_hh = jax.random.uniform(ks[1], (3 * H, H), jnp.float32, -s, s)
    b_ih = jax.random.uniform(ks[2], (3 * H,), jnp.float32, -s, s)
    b_hh = jax.random.uniform(ks[3], (3 * H,), jnp.float32, -s, s)
    s1 = 1.0 / jnp.sqrt(H)
    w1 = jax.random.uniform(ks[4], (H2, H), jnp.float32, -s1, s1)
    b1 = jax.random.uniform(ks[5], (H2,), jnp.float32, -s1, s1)
    s2 = 1.0 / jnp.sqrt(H2)
    w2 = jax.random.uniform(ks[6], (C, H2), jnp.float32, -s2, s2)
    b2 = jax.random.uniform(ks[7], (C,), jnp.float32, -s2, s2)
    params = (w_ih, w_hh, b_ih, b_hh, w1, b1, w2, b2)

    x = jax.random.normal(ks[8], (B, T, I), jnp.float32)
    hidden = jax.random.normal(ks[9], (1, B, H), jnp.float32)

    out = rnn_forward(x, hidden, params)
    out = jax.block_until_ready(out)

    ref = _reference_forward(x, hidden, params)
    assert out.shape == (1, B, C)
    # bf16 MXU operands + approx reciprocal -> loosened tolerance vs f32 ref.
    assert jnp.allclose(jnp.sum(out, axis=-1), 1.0, atol=1e-2), "softmax not normalized"
    assert jnp.allclose(out, ref, atol=2e-2, rtol=2e-2), "mismatch vs reference"

    print("KERNEL_OK")
</pallas_src>

<mosaic_0001>
module attributes {stable_mosaic.version = 11 : i64} {
  func.func @_gru_head_kernel(%arg0: i32, %arg1: i32, %arg2: memref<8x128xf32, #tpu.memory_space<vmem>>, %arg3: memref<8x8x16xbf16, #tpu.memory_space<vmem>>, %arg4: memref<16x384xbf16, #tpu.memory_space<vmem>>, %arg5: memref<128x384xbf16, #tpu.memory_space<vmem>>, %arg6: memref<1x384xf32, #tpu.memory_space<vmem>>, %arg7: memref<1x128xf32, #tpu.memory_space<vmem>>, %arg8: memref<128x128xbf16, #tpu.memory_space<vmem>>, %arg9: memref<1x128xf32, #tpu.memory_space<vmem>>, %arg10: memref<128x128xbf16, #tpu.memory_space<vmem>>, %arg11: memref<1x128xf32, #tpu.memory_space<vmem>>, %arg12: memref<8x128xf32, #tpu.memory_space<vmem>>, %arg13: memref<8x128xf32, #tpu.memory_space<vmem>>, %arg14: memref<64x384xf32, #tpu.memory_space<vmem>>) attributes {dimension_semantics = [#tpu.dimension_semantics<parallel>, #tpu.dimension_semantics<arbitrary>], iteration_bounds = array<i64: 1, 1>, scalar_prefetch = 0 : i64, scratch_operands = 2 : i64, tpu.core_type = #tpu.core_type<tc>, window_params = [{transform_indices = @transform_0, window_bounds = array<i64: 8, 128>}, {transform_indices = @transform_1, window_bounds = array<i64: 8, 8, 16>}, {pipeline_mode = #tpu.pipeline_mode<synchronous>, transform_indices = @transform_2, window_bounds = array<i64: 16, 384>}, {pipeline_mode = #tpu.pipeline_mode<synchronous>, transform_indices = @transform_3, window_bounds = array<i64: 128, 384>}, {pipeline_mode = #tpu.pipeline_mode<synchronous>, transform_indices = @transform_4, window_bounds = array<i64: 1, 384>}, {pipeline_mode = #tpu.pipeline_mode<synchronous>, transform_indices = @transform_5, window_bounds = array<i64: 1, 128>}, {pipeline_mode = #tpu.pipeline_mode<synchronous>, transform_indices = @transform_6, window_bounds = array<i64: 128, 128>}, {pipeline_mode = #tpu.pipeline_mode<synchronous>, transform_indices = @transform_7, window_bounds = array<i64: 1, 128>}, {pipeline_mode = #tpu.pipeline_mode<synchronous>, transform_indices = @transform_8, window_bounds = array<i64: 128, 128>}, {pipeline_mode = #tpu.pipeline_mode<synchronous>, transform_indices = @transform_9, window_bounds = array<i64: 1, 128>}, {transform_indices = @transform_10, window_bounds = array<i64: 8, 128>}]} {
    %c0_i32 = arith.constant 0 : i32
    %0 = arith.cmpi eq, %arg1, %c0_i32 : i32
    %1 = arith.extui %0 : i1 to i32
    %c0_i32_0 = arith.constant 0 : i32
    %2 = arith.cmpi ne, %1, %c0_i32_0 : i32
    scf.if %2 {
      %c0_60 = arith.constant 0 : index
      %c0_61 = arith.constant 0 : index
      %268 = vector.load %arg2[%c0_60, %c0_61] : memref<8x128xf32, #tpu.memory_space<vmem>>, vector<8x128xf32>
      %c0_62 = arith.constant 0 : index
      %c0_63 = arith.constant 0 : index
      %269 = vector.load %arg13[%c0_62, %c0_63] : memref<8x128xf32, #tpu.memory_space<vmem>>, vector<8x128xf32>
      tpu.vector_store %arg13[%c0_62, %c0_63], %268 {strides = array<i32>} : memref<8x128xf32, #tpu.memory_space<vmem>>, vector<8x128xf32>,
    } else {
    }
    %c0 = arith.constant 0 : index
    %c0_1 = arith.constant 0 : index
    %c0_2 = arith.constant 0 : index
    %3 = vector.load %arg3[%c0, %c0_1, %c0_2] : memref<8x8x16xbf16, #tpu.memory_space<vmem>>, vector<8x8x16xbf16>
    %4 = vector.shape_cast %3 : vector<8x8x16xbf16> to vector<64x16xbf16>
    %c0_3 = arith.constant 0 : index
    %c0_4 = arith.constant 0 : index
    %5 = vector.load %arg4[%c0_3, %c0_4] : memref<16x384xbf16, #tpu.memory_space<vmem>>, vector<16x384xbf16>
    %cst = arith.constant dense<0.000000e+00> : vector<64x384xf32>
    %6 = tpu.matmul %4, %5, %cst {dimension_numbers = #tpu.dot_dimension_numbers<[1], [0], [0], [1], [0, 0, 1, 1], [], []>} : vector<64x16xbf16>, vector<16x384xbf16>, vector<64x384xf32> -> vector<64x384xf32>
    %c0_5 = arith.constant 0 : index
    %c0_6 = arith.constant 0 : index
    %7 = vector.load %arg6[%c0_5, %c0_6] : memref<1x384xf32, #tpu.memory_space<vmem>>, vector<1x384xf32>
    %8 = vector.broadcast %7 : vector<1x384xf32> to vector<64x384xf32>
    %9 = arith.addf %6, %8 : vector<64x384xf32>
    %c0_7 = arith.constant 0 : index
    %c0_8 = arith.constant 0 : index
    %10 = vector.load %arg14[%c0_7, %c0_8] : memref<64x384xf32, #tpu.memory_space<vmem>>, vector<64x384xf32>
    tpu.vector_store %arg14[%c0_7, %c0_8], %9 {strides = array<i32>} : memref<64x384xf32, #tpu.memory_space<vmem>>, vector<64x384xf32>,
    %c0_9 = arith.constant 0 : index
    %c0_10 = arith.constant 0 : index
    %11 = vector.load %arg5[%c0_9, %c0_10] : memref<128x384xbf16, #tpu.memory_space<vmem>>, vector<128x384xbf16>
    %c0_11 = arith.constant 0 : index
    %c0_12 = arith.constant 0 : index
    %12 = vector.load %arg7[%c0_11, %c0_12] : memref<1x128xf32, #tpu.memory_space<vmem>>, vector<1x128xf32>
    %13 = vector.shape_cast %12 : vector<1x128xf32> to vector<1x128xf32>
    %14 = vector.broadcast %13 : vector<1x128xf32> to vector<8x128xf32>
    %c0_13 = arith.constant 0 : index
    %c0_14 = arith.constant 0 : index
    %15 = vector.load %arg13[%c0_13, %c0_14] : memref<8x128xf32, #tpu.memory_space<vmem>>, vector<8x128xf32>
    %c0_i32_15 = arith.constant 0 : i32
    %c8_i32 = arith.constant 8 : i32
    %16 = arith.muli %c0_i32_15, %c8_i32 : i32
    %17 = tpu.assume_multiple %16, 8 : i32
    %18 = arith.index_cast %17 : i32 to index
    %c0_16 = arith.constant 0 : index
    %19 = vector.load %arg14[%18, %c0_16] : memref<64x384xf32, #tpu.memory_space<vmem>>, vector<8x384xf32>
    %20 = arith.truncf %15 : vector<8x128xf32> to vector<8x128xbf16>
    %cst_17 = arith.constant dense<0.000000e+00> : vector<8x384xf32>
    %21 = tpu.matmul %20, %11, %cst_17 {dimension_numbers = #tpu.dot_dimension_numbers<[1], [0], [0], [1], [0, 0, 1, 1], [], []>} : vector<8x128xbf16>, vector<128x384xbf16>, vector<8x384xf32> -> vector<8x384xf32>
    %22 = vector.extract_strided_slice %19 {offsets = [0, 0], sizes = [8, 128], strides = [1, 1]} : vector<8x384xf32> to vector<8x128xf32>
    %23 = vector.extract_strided_slice %21 {offsets = [0, 0], sizes = [8, 128], strides = [1, 1]} : vector<8x384xf32> to vector<8x128xf32>
    %24 = arith.addf %22, %23 : vector<8x128xf32>
    %25 = arith.negf %24 : vector<8x128xf32>
    %26 = math.exp %25 : vector<8x128xf32>
    %cst_18 = arith.constant 1.000000e+00 : f32
    %27 = vector.broadcast %cst_18 : f32 to vector<8x128xf32>
    %28 = arith.addf %27, %26 : vector<8x128xf32>
    %29 = arith.divf %27, %28 : vector<8x128xf32>
    %30 = vector.extract_strided_slice %19 {offsets = [0, 128], sizes = [8, 128], strides = [1, 1]} : vector<8x384xf32> to vector<8x128xf32>
    %31 = vector.extract_strided_slice %21 {offsets = [0, 128], sizes = [8, 128], strides = [1, 1]} : vector<8x384xf32> to vector<8x128xf32>
    %32 = arith.addf %30, %31 : vector<8x128xf32>
    %33 = arith.negf %32 : vector<8x128xf32>
    %34 = math.exp %33 : vector<8x128xf32>
    %cst_19 = arith.constant 1.000000e+00 : f32
    %35 = vector.broadcast %cst_19 : f32 to vector<8x128xf32>
    %36 = arith.addf %35, %34 : vector<8x128xf32>
    %37 = arith.divf %35, %36 : vector<8x128xf32>
    %38 = vector.extract_strided_slice %19 {offsets = [0, 256], sizes = [8, 128], strides = [1, 1]} : vector<8x384xf32> to vector<8x128xf32>
    %39 = vector.extract_strided_slice %21 {offsets = [0, 256], sizes = [8, 128], strides = [1, 1]} : vector<8x384xf32> to vector<8x128xf32>
    %40 = arith.addf %39, %14 : vector<8x128xf32>
    %41 = arith.mulf %29, %40 : vector<8x128xf32>
    %42 = arith.addf %38, %41 : vector<8x128xf32>
    %43 = math.tanh %42 : vector<8x128xf32>
    %44 = arith.subf %15, %43 : vector<8x128xf32>
    %45 = arith.mulf %37, %44 : vector<8x128xf32>
    %46 = arith.addf %43, %45 : vector<8x128xf32>
    %c1_i32 = arith.constant 1 : i32
    %c8_i32_20 = arith.constant 8 : i32
    %47 = arith.muli %c1_i32, %c8_i32_20 : i32
    %48 = tpu.assume_multiple %47, 8 : i32
    %49 = arith.index_cast %48 : i32 to index
    %c0_21 = arith.constant 0 : index
    %50 = vector.load %arg14[%49, %c0_21] : memref<64x384xf32, #tpu.memory_space<vmem>>, vector<8x384xf32>
    %51 = arith.truncf %46 : vector<8x128xf32> to vector<8x128xbf16>
    %cst_22 = arith.constant dense<0.000000e+00> : vector<8x384xf32>
    %52 = tpu.matmul %51, %11, %cst_22 {dimension_numbers = #tpu.dot_dimension_numbers<[1], [0], [0], [1], [0, 0, 1, 1], [], []>} : vector<8x128xbf16>, vector<128x384xbf16>, vector<8x384xf32> -> vector<8x384xf32>
    %53 = vector.extract_strided_slice %50 {offsets = [0, 0], sizes = [8, 128], strides = [1, 1]} : vector<8x384xf32> to vector<8x128xf32>
    %54 = vector.extract_strided_slice %52 {offsets = [0, 0], sizes = [8, 128], strides = [1, 1]} : vector<8x384xf32> to vector<8x128xf32>
    %55 = arith.addf %53, %54 : vector<8x128xf32>
    %56 = arith.negf %55 : vector<8x128xf32>
    %57 = math.exp %56 : vector<8x128xf32>
    %cst_23 = arith.constant 1.000000e+00 : f32
    %58 = vector.broadcast %cst_23 : f32 to vector<8x128xf32>
    %59 = arith.addf %58, %57 : vector<8x128xf32>
    %60 = arith.divf %58, %59 : vector<8x128xf32>
    %61 = vector.extract_strided_slice %50 {offsets = [0, 128], sizes = [8, 128], strides = [1, 1]} : vector<8x384xf32> to vector<8x128xf32>
    %62 = vector.extract_strided_slice %52 {offsets = [0, 128], sizes = [8, 128], strides = [1, 1]} : vector<8x384xf32> to vector<8x128xf32>
    %63 = arith.addf %61, %62 : vector<8x128xf32>
    %64 = arith.negf %63 : vector<8x128xf32>
    %65 = math.exp %64 : vector<8x128xf32>
    %cst_24 = arith.constant 1.000000e+00 : f32
    %66 = vector.broadcast %cst_24 : f32 to vector<8x128xf32>
    %67 = arith.addf %66, %65 : vector<8x128xf32>
    %68 = arith.divf %66, %67 : vector<8x128xf32>
    %69 = vector.extract_strided_slice %50 {offsets = [0, 256], sizes = [8, 128], strides = [1, 1]} : vector<8x384xf32> to vector<8x128xf32>
    %70 = vector.extract_strided_slice %52 {offsets = [0, 256], sizes = [8, 128], strides = [1, 1]} : vector<8x384xf32> to vector<8x128xf32>
    %71 = arith.addf %70, %14 : vector<8x128xf32>
    %72 = arith.mulf %60, %71 : vector<8x128xf32>
    %73 = arith.addf %69, %72 : vector<8x128xf32>
    %74 = math.tanh %73 : vector<8x128xf32>
    %75 = arith.subf %46, %74 : vector<8x128xf32>
    %76 = arith.mulf %68, %75 : vector<8x128xf32>
    %77 = arith.addf %74, %76 : vector<8x128xf32>
    %c2_i32 = arith.constant 2 : i32
    %c8_i32_25 = arith.constant 8 : i32
    %78 = arith.muli %c2_i32, %c8_i32_25 : i32
    %79 = tpu.assume_multiple %78, 8 : i32
    %80 = arith.index_cast %79 : i32 to index
    %c0_26 = arith.constant 0 : index
    %81 = vector.load %arg14[%80, %c0_26] : memref<64x384xf32, #tpu.memory_space<vmem>>, vector<8x384xf32>
    %82 = arith.truncf %77 : vector<8x128xf32> to vector<8x128xbf16>
    %cst_27 = arith.constant dense<0.000000e+00> : vector<8x384xf32>
    %83 = tpu.matmul %82, %11, %cst_27 {dimension_numbers = #tpu.dot_dimension_numbers<[1], [0], [0], [1], [0, 0, 1, 1], [], []>} : vector<8x128xbf16>, vector<128x384xbf16>, vector<8x384xf32> -> vector<8x384xf32>
    %84 = vector.extract_strided_slice %81 {offsets = [0, 0], sizes = [8, 128], strides = [1, 1]} : vector<8x384xf32> to vector<8x128xf32>
    %85 = vector.extract_strided_slice %83 {offsets = [0, 0], sizes = [8, 128], strides = [1, 1]} : vector<8x384xf32> to vector<8x128xf32>
    %86 = arith.addf %84, %85 : vector<8x128xf32>
    %87 = arith.negf %86 : vector<8x128xf32>
    %88 = math.exp %87 : vector<8x128xf32>
    %cst_28 = arith.constant 1.000000e+00 : f32
    %89 = vector.broadcast %cst_28 : f32 to vector<8x128xf32>
    %90 = arith.addf %89, %88 : vector<8x128xf32>
    %91 = arith.divf %89, %90 : vector<8x128xf32>
    %92 = vector.extract_strided_slice %81 {offsets = [0, 128], sizes = [8, 128], strides = [1, 1]} : vector<8x384xf32> to vector<8x128xf32>
    %93 = vector.extract_strided_slice %83 {offsets = [0, 128], sizes = [8, 128], strides = [1, 1]} : vector<8x384xf32> to vector<8x128xf32>
    %94 = arith.addf %92, %93 : vector<8x128xf32>
    %95 = arith.negf %94 : vector<8x128xf32>
    %96 = math.exp %95 : vector<8x128xf32>
    %cst_29 = arith.constant 1.000000e+00 : f32
    %97 = vector.broadcast %cst_29 : f32 to vector<8x128xf32>
    %98 = arith.addf %97, %96 : vector<8x128xf32>
    %99 = arith.divf %97, %98 : vector<8x128xf32>
    %100 = vector.extract_strided_slice %81 {offsets = [0, 256], sizes = [8, 128], strides = [1, 1]} : vector<8x384xf32> to vector<8x128xf32>
    %101 = vector.extract_strided_slice %83 {offsets = [0, 256], sizes = [8, 128], strides = [1, 1]} : vector<8x384xf32> to vector<8x128xf32>
    %102 = arith.addf %101, %14 : vector<8x128xf32>
    %103 = arith.mulf %91, %102 : vector<8x128xf32>
    %104 = arith.addf %100, %103 : vector<8x128xf32>
    %105 = math.tanh %104 : vector<8x128xf32>
    %106 = arith.subf %77, %105 : vector<8x128xf32>
    %107 = arith.mulf %99, %106 : vector<8x128xf32>
    %108 = arith.addf %105, %107 : vector<8x128xf32>
    %c3_i32 = arith.constant 3 : i32
    %c8_i32_30 = arith.constant 8 : i32
    %109 = arith.muli %c3_i32, %c8_i32_30 : i32
    %110 = tpu.assume_multiple %109, 8 : i32
    %111 = arith.index_cast %110 : i32 to index
    %c0_31 = arith.constant 0 : index
    %112 = vector.load %arg14[%111, %c0_31] : memref<64x384xf32, #tpu.memory_space<vmem>>, vector<8x384xf32>
    %113 = arith.truncf %108 : vector<8x128xf32> to vector<8x128xbf16>
    %cst_32 = arith.constant dense<0.000000e+00> : vector<8x384xf32>
    %114 = tpu.matmul %113, %11, %cst_32 {dimension_numbers = #tpu.dot_dimension_numbers<[1], [0], [0], [1], [0, 0, 1, 1], [], []>} : vector<8x128xbf16>, vector<128x384xbf16>, vector<8x384xf32> -> vector<8x384xf32>
    %115 = vector.extract_strided_slice %112 {offsets = [0, 0], sizes = [8, 128], strides = [1, 1]} : vector<8x384xf32> to vector<8x128xf32>
    %116 = vector.extract_strided_slice %114 {offsets = [0, 0], sizes = [8, 128], strides = [1, 1]} : vector<8x384xf32> to vector<8x128xf32>
    %117 = arith.addf %115, %116 : vector<8x128xf32>
    %118 = arith.negf %117 : vector<8x128xf32>
    %119 = math.exp %118 : vector<8x128xf32>
    %cst_33 = arith.constant 1.000000e+00 : f32
    %120 = vector.broadcast %cst_33 : f32 to vector<8x128xf32>
    %121 = arith.addf %120, %119 : vector<8x128xf32>
    %122 = arith.divf %120, %121 : vector<8x128xf32>
    %123 = vector.extract_strided_slice %112 {offsets = [0, 128], sizes = [8, 128], strides = [1, 1]} : vector<8x384xf32> to vector<8x128xf32>
    %124 = vector.extract_strided_slice %114 {offsets = [0, 128], sizes = [8, 128], strides = [1, 1]} : vector<8x384xf32> to vector<8x128xf32>
    %125 = arith.addf %123, %124 : vector<8x128xf32>
    %126 = arith.negf %125 : vector<8x128xf32>
    %127 = math.exp %126 : vector<8x128xf32>
    %cst_34 = arith.constant 1.000000e+00 : f32
    %128 = vector.broadcast %cst_34 : f32 to vector<8x128xf32>
    %129 = arith.addf %128, %127 : vector<8x128xf32>
    %130 = arith.divf %128, %129 : vector<8x128xf32>
    %131 = vector.extract_strided_slice %112 {offsets = [0, 256], sizes = [8, 128], strides = [1, 1]} : vector<8x384xf32> to vector<8x128xf32>
    %132 = vector.extract_strided_slice %114 {offsets = [0, 256], sizes = [8, 128], strides = [1, 1]} : vector<8x384xf32> to vector<8x128xf32>
    %133 = arith.addf %132, %14 : vector<8x128xf32>
    %134 = arith.mulf %122, %133 : vector<8x128xf32>
    %135 = arith.addf %131, %134 : vector<8x128xf32>
    %136 = math.tanh %135 : vector<8x128xf32>
    %137 = arith.subf %108, %136 : vector<8x128xf32>
    %138 = arith.mulf %130, %137 : vector<8x128xf32>
    %139 = arith.addf %136, %138 : vector<8x128xf32>
    %c4_i32 = arith.constant 4 : i32
    %c8_i32_35 = arith.constant 8 : i32
    %140 = arith.muli %c4_i32, %c8_i32_35 : i32
    %141 = tpu.assume_multiple %140, 8 : i32
    %142 = arith.index_cast %141 : i32 to index
    %c0_36 = arith.constant 0 : index
    %143 = vector.load %arg14[%142, %c0_36] : memref<64x384xf32, #tpu.memory_space<vmem>>, vector<8x384xf32>
    %144 = arith.truncf %139 : vector<8x128xf32> to vector<8x128xbf16>
    %cst_37 = arith.constant dense<0.000000e+00> : vector<8x384xf32>
    %145 = tpu.matmul %144, %11, %cst_37 {dimension_numbers = #tpu.dot_dimension_numbers<[1], [0], [0], [1], [0, 0, 1, 1], [], []>} : vector<8x128xbf16>, vector<128x384xbf16>, vector<8x384xf32> -> vector<8x384xf32>
    %146 = vector.extract_strided_slice %143 {offsets = [0, 0], sizes = [8, 128], strides = [1, 1]} : vector<8x384xf32> to vector<8x128xf32>
    %147 = vector.extract_strided_slice %145 {offsets = [0, 0], sizes = [8, 128], strides = [1, 1]} : vector<8x384xf32> to vector<8x128xf32>
    %148 = arith.addf %146, %147 : vector<8x128xf32>
    %149 = arith.negf %148 : vector<8x128xf32>
    %150 = math.exp %149 : vector<8x128xf32>
    %cst_38 = arith.constant 1.000000e+00 : f32
    %151 = vector.broadcast %cst_38 : f32 to vector<8x128xf32>
    %152 = arith.addf %151, %150 : vector<8x128xf32>
    %153 = arith.divf %151, %152 : vector<8x128xf32>
    %154 = vector.extract_strided_slice %143 {offsets = [0, 128], sizes = [8, 128], strides = [1, 1]} : vector<8x384xf32> to vector<8x128xf32>
    %155 = vector.extract_strided_slice %145 {offsets = [0, 128], sizes = [8, 128], strides = [1, 1]} : vector<8x384xf32> to vector<8x128xf32>
    %156 = arith.addf %154, %155 : vector<8x128xf32>
    %157 = arith.negf %156 : vector<8x128xf32>
    %158 = math.exp %157 : vector<8x128xf32>
    %cst_39 = arith.constant 1.000000e+00 : f32
    %159 = vector.broadcast %cst_39 : f32 to vector<8x128xf32>
    %160 = arith.addf %159, %158 : vector<8x128xf32>
    %161 = arith.divf %159, %160 : vector<8x128xf32>
    %162 = vector.extract_strided_slice %143 {offsets = [0, 256], sizes = [8, 128], strides = [1, 1]} : vector<8x384xf32> to vector<8x128xf32>
    %163 = vector.extract_strided_slice %145 {offsets = [0, 256], sizes = [8, 128], strides = [1, 1]} : vector<8x384xf32> to vector<8x128xf32>
    %164 = arith.addf %163, %14 : vector<8x128xf32>
    %165 = arith.mulf %153, %164 : vector<8x128xf32>
    %166 = arith.addf %162, %165 : vector<8x128xf32>
    %167 = math.tanh %166 : vector<8x128xf32>
    %168 = arith.subf %139, %167 : vector<8x128xf32>
    %169 = arith.mulf %161, %168 : vector<8x128xf32>
    %170 = arith.addf %167, %169 : vector<8x128xf32>
    %c5_i32 = arith.constant 5 : i32
    %c8_i32_40 = arith.constant 8 : i32
    %171 = arith.muli %c5_i32, %c8_i32_40 : i32
    %172 = tpu.assume_multiple %171, 8 : i32
    %173 = arith.index_cast %172 : i32 to index
    %c0_41 = arith.constant 0 : index
    %174 = vector.load %arg14[%173, %c0_41] : memref<64x384xf32, #tpu.memory_space<vmem>>, vector<8x384xf32>
    %175 = arith.truncf %170 : vector<8x128xf32> to vector<8x128xbf16>
    %cst_42 = arith.constant dense<0.000000e+00> : vector<8x384xf32>
    %176 = tpu.matmul %175, %11, %cst_42 {dimension_numbers = #tpu.dot_dimension_numbers<[1], [0], [0], [1], [0, 0, 1, 1], [], []>} : vector<8x128xbf16>, vector<128x384xbf16>, vector<8x384xf32> -> vector<8x384xf32>
    %177 = vector.extract_strided_slice %174 {offsets = [0, 0], sizes = [8, 128], strides = [1, 1]} : vector<8x384xf32> to vector<8x128xf32>
    %178 = vector.extract_strided_slice %176 {offsets = [0, 0], sizes = [8, 128], strides = [1, 1]} : vector<8x384xf32> to vector<8x128xf32>
    %179 = arith.addf %177, %178 : vector<8x128xf32>
    %180 = arith.negf %179 : vector<8x128xf32>
    %181 = math.exp %180 : vector<8x128xf32>
    %cst_43 = arith.constant 1.000000e+00 : f32
    %182 = vector.broadcast %cst_43 : f32 to vector<8x128xf32>
    %183 = arith.addf %182, %181 : vector<8x128xf32>
    %184 = arith.divf %182, %183 : vector<8x128xf32>
    %185 = vector.extract_strided_slice %174 {offsets = [0, 128], sizes = [8, 128], strides = [1, 1]} : vector<8x384xf32> to vector<8x128xf32>
    %186 = vector.extract_strided_slice %176 {offsets = [0, 128], sizes = [8, 128], strides = [1, 1]} : vector<8x384xf32> to vector<8x128xf32>
    %187 = arith.addf %185, %186 : vector<8x128xf32>
    %188 = arith.negf %187 : vector<8x128xf32>
    %189 = math.exp %188 : vector<8x128xf32>
    %cst_44 = arith.constant 1.000000e+00 : f32
    %190 = vector.broadcast %cst_44 : f32 to vector<8x128xf32>
    %191 = arith.addf %190, %189 : vector<8x128xf32>
    %192 = arith.divf %190, %191 : vector<8x128xf32>
    %193 = vector.extract_strided_slice %174 {offsets = [0, 256], sizes = [8, 128], strides = [1, 1]} : vector<8x384xf32> to vector<8x128xf32>
    %194 = vector.extract_strided_slice %176 {offsets = [0, 256], sizes = [8, 128], strides = [1, 1]} : vector<8x384xf32> to vector<8x128xf32>
    %195 = arith.addf %194, %14 : vector<8x128xf32>
    %196 = arith.mulf %184, %195 : vector<8x128xf32>
    %197 = arith.addf %193, %196 : vector<8x128xf32>
    %198 = math.tanh %197 : vector<8x128xf32>
    %199 = arith.subf %170, %198 : vector<8x128xf32>
    %200 = arith.mulf %192, %199 : vector<8x128xf32>
    %201 = arith.addf %198, %200 : vector<8x128xf32>
    %c6_i32 = arith.constant 6 : i32
    %c8_i32_45 = arith.constant 8 : i32
    %202 = arith.muli %c6_i32, %c8_i32_45 : i32
    %203 = tpu.assume_multiple %202, 8 : i32
    %204 = arith.index_cast %203 : i32 to index
    %c0_46 = arith.constant 0 : index
    %205 = vector.load %arg14[%204, %c0_46] : memref<64x384xf32, #tpu.memory_space<vmem>>, vector<8x384xf32>
    %206 = arith.truncf %201 : vector<8x128xf32> to vector<8x128xbf16>
    %cst_47 = arith.constant dense<0.000000e+00> : vector<8x384xf32>
    %207 = tpu.matmul %206, %11, %cst_47 {dimension_numbers = #tpu.dot_dimension_numbers<[1], [0], [0], [1], [0, 0, 1, 1], [], []>} : vector<8x128xbf16>, vector<128x384xbf16>, vector<8x384xf32> -> vector<8x384xf32>
    %208 = vector.extract_strided_slice %205 {offsets = [0, 0], sizes = [8, 128], strides = [1, 1]} : vector<8x384xf32> to vector<8x128xf32>
    %209 = vector.extract_strided_slice %207 {offsets = [0, 0], sizes = [8, 128], strides = [1, 1]} : vector<8x384xf32> to vector<8x128xf32>
    %210 = arith.addf %208, %209 : vector<8x128xf32>
    %211 = arith.negf %210 : vector<8x128xf32>
    %212 = math.exp %211 : vector<8x128xf32>
    %cst_48 = arith.constant 1.000000e+00 : f32
    %213 = vector.broadcast %cst_48 : f32 to vector<8x128xf32>
    %214 = arith.addf %213, %212 : vector<8x128xf32>
    %215 = arith.divf %213, %214 : vector<8x128xf32>
    %216 = vector.extract_strided_slice %205 {offsets = [0, 128], sizes = [8, 128], strides = [1, 1]} : vector<8x384xf32> to vector<8x128xf32>
    %217 = vector.extract_strided_slice %207 {offsets = [0, 128], sizes = [8, 128], strides = [1, 1]} : vector<8x384xf32> to vector<8x128xf32>
    %218 = arith.addf %216, %217 : vector<8x128xf32>
    %219 = arith.negf %218 : vector<8x128xf32>
    %220 = math.exp %219 : vector<8x128xf32>
    %cst_49 = arith.constant 1.000000e+00 : f32
    %221 = vector.broadcast %cst_49 : f32 to vector<8x128xf32>
    %222 = arith.addf %221, %220 : vector<8x128xf32>
    %223 = arith.divf %221, %222 : vector<8x128xf32>
    %224 = vector.extract_strided_slice %205 {offsets = [0, 256], sizes = [8, 128], strides = [1, 1]} : vector<8x384xf32> to vector<8x128xf32>
    %225 = vector.extract_strided_slice %207 {offsets = [0, 256], sizes = [8, 128], strides = [1, 1]} : vector<8x384xf32> to vector<8x128xf32>
    %226 = arith.addf %225, %14 : vector<8x128xf32>
    %227 = arith.mulf %215, %226 : vector<8x128xf32>
    %228 = arith.addf %224, %227 : vector<8x128xf32>
    %229 = math.tanh %228 : vector<8x128xf32>
    %230 = arith.subf %201, %229 : vector<8x128xf32>
    %231 = arith.mulf %223, %230 : vector<8x128xf32>
    %232 = arith.addf %229, %231 : vector<8x128xf32>
    %c7_i32 = arith.constant 7 : i32
    %c8_i32_50 = arith.constant 8 : i32
    %233 = arith.muli %c7_i32, %c8_i32_50 : i32
    %234 = tpu.assume_multiple %233, 8 : i32
    %235 = arith.index_cast %234 : i32 to index
    %c0_51 = arith.constant 0 : index
    %236 = vector.load %arg14[%235, %c0_51] : memref<64x384xf32, #tpu.memory_space<vmem>>, vector<8x384xf32>
    %237 = arith.truncf %232 : vector<8x128xf32> to vector<8x128xbf16>
    %cst_52 = arith.constant dense<0.000000e+00> : vector<8x384xf32>
    %238 = tpu.matmul %237, %11, %cst_52 {dimension_numbers = #tpu.dot_dimension_numbers<[1], [0], [0], [1], [0, 0, 1, 1], [], []>} : vector<8x128xbf16>, vector<128x384xbf16>, vector<8x384xf32> -> vector<8x384xf32>
    %239 = vector.extract_strided_slice %236 {offsets = [0, 0], sizes = [8, 128], strides = [1, 1]} : vector<8x384xf32> to vector<8x128xf32>
    %240 = vector.extract_strided_slice %238 {offsets = [0, 0], sizes = [8, 128], strides = [1, 1]} : vector<8x384xf32> to vector<8x128xf32>
    %241 = arith.addf %239, %240 : vector<8x128xf32>
    %242 = arith.negf %241 : vector<8x128xf32>
    %243 = math.exp %242 : vector<8x128xf32>
    %cst_53 = arith.constant 1.000000e+00 : f32
    %244 = vector.broadcast %cst_53 : f32 to vector<8x128xf32>
    %245 = arith.addf %244, %243 : vector<8x128xf32>
    %246 = arith.divf %244, %245 : vector<8x128xf32>
    %247 = vector.extract_strided_slice %236 {offsets = [0, 128], sizes = [8, 128], strides = [1, 1]} : vector<8x384xf32> to vector<8x128xf32>
    %248 = vector.extract_strided_slice %238 {offsets = [0, 128], sizes = [8, 128], strides = [1, 1]} : vector<8x384xf32> to vector<8x128xf32>
    %249 = arith.addf %247, %248 : vector<8x128xf32>
    %250 = arith.negf %249 : vector<8x128xf32>
    %251 = math.exp %250 : vector<8x128xf32>
    %cst_54 = arith.constant 1.000000e+00 : f32
    %252 = vector.broadcast %cst_54 : f32 to vector<8x128xf32>
    %253 = arith.addf %252, %251 : vector<8x128xf32>
    %254 = arith.divf %252, %253 : vector<8x128xf32>
    %255 = vector.extract_strided_slice %236 {offsets = [0, 256], sizes = [8, 128], strides = [1, 1]} : vector<8x384xf32> to vector<8x128xf32>
    %256 = vector.extract_strided_slice %238 {offsets = [0, 256], sizes = [8, 128], strides = [1, 1]} : vector<8x384xf32> to vector<8x128xf32>
    %257 = arith.addf %256, %14 : vector<8x128xf32>
    %258 = arith.mulf %246, %257 : vector<8x128xf32>
    %259 = arith.addf %255, %258 : vector<8x128xf32>
    %260 = math.tanh %259 : vector<8x128xf32>
    %261 = arith.subf %232, %260 : vector<8x128xf32>
    %262 = arith.mulf %254, %261 : vector<8x128xf32>
    %263 = arith.addf %260, %262 : vector<8x128xf32>
    %c8_i32_55 = arith.constant 8 : i32
    %c0_56 = arith.constant 0 : index
    %c0_57 = arith.constant 0 : index
    %264 = vector.load %arg13[%c0_56, %c0_57] : memref<8x128xf32, #tpu.memory_space<vmem>>, vector<8x128xf32>
    tpu.vector_store %arg13[%c0_56, %c0_57], %263 {strides = array<i32>} : memref<8x128xf32, #tpu.memory_space<vmem>>, vector<8x128xf32>,
    %c0_i32_58 = arith.constant 0 : i32
    %265 = arith.cmpi eq, %arg1, %c0_i32_58 : i32
    %266 = arith.extui %265 : i1 to i32
    %c0_i32_59 = arith.constant 0 : i32
    %267 = arith.cmpi ne, %266, %c0_i32_59 : i32
    scf.if %267 {
      %268 = arith.truncf %263 : vector<8x128xf32> to vector<8x128xbf16>
      %c0_60 = arith.constant 0 : index
      %c0_61 = arith.constant 0 : index
      %269 = vector.load %arg8[%c0_60, %c0_61] : memref<128x128xbf16, #tpu.memory_space<vmem>>, vector<128x128xbf16>
      %cst_62 = arith.constant dense<0.000000e+00> : vector<8x128xf32>
      %270 = tpu.matmul %268, %269, %cst_62 {dimension_numbers = #tpu.dot_dimension_numbers<[1], [0], [0], [1], [0, 0, 1, 1], [], []>} : vector<8x128xbf16>, vector<128x128xbf16>, vector<8x128xf32> -> vector<8x128xf32>
      %c0_63 = arith.constant 0 : index
      %c0_64 = arith.constant 0 : index
      %271 = vector.load %arg9[%c0_63, %c0_64] : memref<1x128xf32, #tpu.memory_space<vmem>>, vector<1x128xf32>
      %272 = vector.broadcast %271 : vector<1x128xf32> to vector<8x128xf32>
      %273 = arith.addf %270, %272 : vector<8x128xf32>
      %cst_65 = arith.constant 0.000000e+00 : f32
      %274 = vector.broadcast %cst_65 : f32 to vector<8x128xf32>
      %275 = arith.maximumf %273, %274 : vector<8x128xf32>
      %276 = arith.truncf %275 : vector<8x128xf32> to vector<8x128xbf16>
      %c0_66 = arith.constant 0 : index
      %c0_67 = arith.constant 0 : index
      %277 = vector.load %arg10[%c0_66, %c0_67] : memref<128x128xbf16, #tpu.memory_space<vmem>>, vector<128x128xbf16>
      %cst_68 = arith.constant dense<0.000000e+00> : vector<8x128xf32>
      %278 = tpu.matmul %276, %277, %cst_68 {dimension_numbers = #tpu.dot_dimension_numbers<[1], [0], [0], [1], [0, 0, 1, 1], [], []>} : vector<8x128xbf16>, vector<128x128xbf16>, vector<8x128xf32> -> vector<8x128xf32>
      %c0_69 = arith.constant 0 : index
      %c0_70 = arith.constant 0 : index
      %279 = vector.load %arg11[%c0_69, %c0_70] : memref<1x128xf32, #tpu.memory_space<vmem>>, vector<1x128xf32>
      %280 = vector.broadcast %279 : vector<1x128xf32> to vector<8x128xf32>
      %281 = arith.addf %278, %280 : vector<8x128xf32>
      %cst_71 = arith.constant 0.000000e+00 : f32
      %282 = vector.broadcast %cst_71 : f32 to vector<8x128xf32>
      %283 = arith.maximumf %281, %282 : vector<8x128xf32>
      %284 = tpu.iota {dimensions = array<i32: 1>} : vector<8x128xi32>
      %c4_i32_72 = arith.constant 4 : i32
      %285 = vector.broadcast %c4_i32_72 : i32 to vector<8x128xi32>
      %286 = arith.cmpi slt, %284, %285 : vector<8x128xi32>
      %cst_73 = arith.constant -1.000000e+30 : f32
      %287 = vector.broadcast %cst_73 : f32 to vector<8x128xf32>
      %288 = arith.select %286, %283, %287 : vector<8x128xi1>, vector<8x128xf32>
      %cst_74 = arith.constant dense<0xFF800000> : vector<8xf32>
      %289 = vector.multi_reduction <maximumf>, %288, %cst_74 [1] : vector<8x128xf32> to vector<8xf32>
      %290 = vector.shape_cast %289 : vector<8xf32> to vector<8x1xf32>
      %291 = vector.broadcast %290 : vector<8x1xf32> to vector<8x128xf32>
      %292 = arith.subf %288, %291 : vector<8x128xf32>
      %293 = math.exp %292 : vector<8x128xf32>
      %cst_75 = arith.constant dense<0.000000e+00> : vector<8xf32>
      %294 = vector.multi_reduction <add>, %293, %cst_75 [1] : vector<8x128xf32> to vector<8xf32>
      %295 = vector.shape_cast %294 : vector<8xf32> to vector<8x1xf32>
      %296 = tpu.reciprocal %295 {approx = true} : vector<8x1xf32> -> vector<8x1xf32>
      %297 = vector.broadcast %296 : vector<8x1xf32> to vector<8x128xf32>
      %298 = arith.mulf %293, %297 : vector<8x128xf32>
      %c0_76 = arith.constant 0 : index
      %c0_77 = arith.constant 0 : index
      %299 = vector.load %arg12[%c0_76, %c0_77] : memref<8x128xf32, #tpu.memory_space<vmem>>, vector<8x128xf32>
      tpu.vector_store %arg12[%c0_76, %c0_77], %298 {strides = array<i32>} : memref<8x128xf32, #tpu.memory_space<vmem>>, vector<8x128xf32>,
    } else {
    }
    return
  }
  func.func @transform_0(%arg0: i32, %arg1: i32) -> (i32, i32) {
    %c0_i32 = arith.constant 0 : i32
    %c0_i32_0 = arith.constant 0 : i32
    return %arg0, %c0_i32 : i32, i32
  }
  func.func @transform_1(%arg0: i32, %arg1: i32) -> (i32, i32, i32) {
    %c0_i32 = arith.constant 0 : i32
    %c0_i32_0 = arith.constant 0 : i32
    return %arg1, %arg0, %c0_i32 : i32, i32, i32
  }
  func.func @transform_2(%arg0: i32, %arg1: i32) -> (i32, i32) {
    %c0_i32 = arith.constant 0 : i32
    %c0_i32_0 = arith.constant 0 : i32
    %c0_i32_1 = arith.constant 0 : i32
    return %c0_i32, %c0_i32_0 : i32, i32
  }
  func.func @transform_3(%arg0: i32, %arg1: i32) -> (i32, i32) {
    %c0_i32 = arith.constant 0 : i32
    %c0_i32_0 = arith.constant 0 : i32
    %c0_i32_1 = arith.constant 0 : i32
    return %c0_i32, %c0_i32_0 : i32, i32
  }
  func.func @transform_4(%arg0: i32, %arg1: i32) -> (i32, i32) {
    %c0_i32 = arith.constant 0 : i32
    %c0_i32_0 = arith.constant 0 : i32
    %c0_i32_1 = arith.constant 0 : i32
    return %c0_i32, %c0_i32_0 : i32, i32
  }
  func.func @transform_5(%arg0: i32, %arg1: i32) -> (i32, i32) {
    %c0_i32 = arith.constant 0 : i32
    %c0_i32_0 = arith.constant 0 : i32
    %c0_i32_1 = arith.constant 0 : i32
    return %c0_i32, %c0_i32_0 : i32, i32
  }
  func.func @transform_6(%arg0: i32, %arg1: i32) -> (i32, i32) {
    %c0_i32 = arith.constant 0 : i32
    %c0_i32_0 = arith.constant 0 : i32
    %c0_i32_1 = arith.constant 0 : i32
    return %c0_i32, %c0_i32_0 : i32, i32
  }
  func.func @transform_7(%arg0: i32, %arg1: i32) -> (i32, i32) {
    %c0_i32 = arith.constant 0 : i32
    %c0_i32_0 = arith.constant 0 : i32
    %c0_i32_1 = arith.constant 0 : i32
    return %c0_i32, %c0_i32_0 : i32, i32
  }
  func.func @transform_8(%arg0: i32, %arg1: i32) -> (i32, i32) {
    %c0_i32 = arith.constant 0 : i32
    %c0_i32_0 = arith.constant 0 : i32
    %c0_i32_1 = arith.constant 0 : i32
    return %c0_i32, %c0_i32_0 : i32, i32
  }
  func.func @transform_9(%arg0: i32, %arg1: i32) -> (i32, i32) {
    %c0_i32 = arith.constant 0 : i32
    %c0_i32_0 = arith.constant 0 : i32
    %c0_i32_1 = arith.constant 0 : i32
    return %c0_i32, %c0_i32_0 : i32, i32
  }
  func.func @transform_10(%arg0: i32, %arg1: i32) -> (i32, i32) {
    %c0_i32 = arith.constant 0 : i32
    %c0_i32_0 = arith.constant 0 : i32
    return %arg0, %c0_i32 : i32, i32
  }
}

</mosaic_0001>

<bundles_post_ra>
// kernel: rnn_forward.1
= control target key start
LH: loop header
LB: loop body
LE: loop exit
PB: predicated region body
PF: predicated region fallthrough
CT: control target
= control target key end

     0   :  { %v2879_v1 = vmov 0   ;;  %vm107_vm0 = vcmask 130048   ;;  %v2881_v16 = vmov 0.0   ;;  %vm2121_vm1 = vmmov 0   ;;  %s2867_s2 = inlined_call_operand.vmem [shape: bf16[16,384], index: 2, kind: input, shape index: {}]   ;;  %s2868_s1 = inlined_call_operand.vmem [shape: bf16[8,8,16], index: 1, kind: input, shape index: {}]   ;;  %s2869_s3 = inlined_call_operand.vmem [shape: bf16[128,384], index: 3, kind: input, shape index: {}]   ;;  %s2870_s0 = inlined_call_operand.vmem [shape: f32[8,128], index: 0, kind: input, shape index: {}]   ;;  %s2871_s4 = inlined_call_operand.vmem [shape: f32[1,384], index: 4, kind: input, shape index: {}]   ;;  %s2872_s5 = inlined_call_operand.vmem [shape: f32[1,128], index: 5, kind: input, shape index: {}]   ;;  %s2873_s6 = inlined_call_operand.vmem [shape: bf16[128,128], index: 6, kind: input, shape index: {}]   ;;  %s2874_s8 = inlined_call_operand.vmem [shape: bf16[128,128], index: 8, kind: input, shape index: {}]   ;;  %s2875_s7 = inlined_call_operand.vmem [shape: f32[1,128], index: 7, kind: input, shape index: {}]   ;;  %s2876_s9 = inlined_call_operand.vmem [shape: f32[1,128], index: 9, kind: input, shape index: {}]   ;;  %s2877_s10 = inlined_call_operand.vmem [shape: f32[8,128], index: 10, kind: output, shape index: {}]  }
   0x1   :  { %v1959_v0 = vld [vmem:[%s2867_s2 + $0x4] ss:$12 sps:$4 sm:$0xff]   ;;  %152 = vmatprep.mubr.bf16.mxu0 %v2879_v1  ;;  %v1961_v2 = vld [vmem:[%s2867_s2] ss:$12 sps:$4 sm:$0xff]   ;;  %v2200_v6 = vld [vmem:[%s2869_s3 + $0x1c] ss:$12 sps:$4 sm:$0xff]   ;;  %v2878_v35 = vlaneseq }
   0x2   :  { %120 = vmatprep.subr.bf16.mxu0 %v1959_v0  ;;  %v1962_v3 = vld [vmem:[%s2868_s1] sm:$0xff]   ;;  %v1969_v9 = vld [vmem:[%s2868_s1 + $0x8] sm:$0xff]   ;;  %v2224_v10 = vld [vmem:[%s2869_s3 + $0x30] ss:$12 sps:$4 sm:$0xff]  }
   0x3   :  { %121 = vmatpush1.bf16.msra.mxu0 %v1961_v2  ;;  %v2190_v4 = vld [vmem:[%s2869_s3 + $0x4] ss:$12 sps:$4 sm:$0xff]   ;;  %v2195_v5 = vld [vmem:[%s2869_s3] ss:$12 sps:$4 sm:$0xff]   ;;  %1748 = vmatprep.mubr.msk.bf16.mxu1 %vm107_vm0, %v1962_v3  ;;  %v1980_v11 = vld [vmem:[%s2867_s2 + $0x8] ss:$12 sps:$4 sm:$0xff]  }
   0x4   :  { %457 = vmatprep.subr.bf16.mxu0 %v2190_v4  ;;  %v2209_v7 = vld [vmem:[%s2869_s3 + $0x18] ss:$12 sps:$4 sm:$0xff]   ;;  %v2216_v8 = vld [vmem:[%s2869_s3 + $0x34] ss:$12 sps:$4 sm:$0xff]   ;;  %1746 = vmatprep.subr.bf16.mxu1 %v1980_v11  ;;  %v2278_v20 = vld [vmem:[%s2869_s3 + $0x7c] ss:$12 sps:$4 sm:$0xff]  }
   0x5   :  { %v2234_v12 = vld [vmem:[%s2869_s3 + $0x4c] ss:$12 sps:$4 sm:$0xff]   ;;  %v2240_v13 = vld [vmem:[%s2869_s3 + $0x48] ss:$12 sps:$4 sm:$0xff]   ;;  %1747 = vmatpush3.bf16.msra.mxu1 %v1980_v11  ;;  %v2250_v15 = vld [vmem:[%s2869_s3 + $0x64] ss:$12 sps:$4 sm:$0xff]  }
   0x6   :  { %1584 = vmatmul.mubr.msk.bf16.vlgmr.msra.gmra.mrb[0].mxu0 %vm107_vm0, %v1962_v3  ;;  %v1976_v14 = vld [vmem:[%s2868_s1 + $0x10] sm:$0xff]   ;;  %1756 = vmatprep.subr.bf16.mxu1 %v2881_v16  ;;  %v2264_v18 = vld [vmem:[%s2869_s3 + $0x20] ss:$12 sps:$4 sm:$0xff]   ;;  %v2283_v21 = vld [vmem:[%s2869_s3 + $0x78] ss:$12 sps:$4 sm:$0xff]   ;;  %v57_v36 = vshrl.u32 %v2878_v35, 7 }
   0x7   :  { %458 = vmatpush1.bf16.msra.mxu0 %v2195_v5  ;;  %162 = vmatprep.mubr.bf16.mxu0 %v2879_v1  ;;  %v2257_v17 = vld [vmem:[%s2869_s3 + $0x8] ss:$12 sps:$4 sm:$0xff]   ;;  %v2271_v19 = vld [vmem:[%s2869_s3 + $0x60] ss:$12 sps:$4 sm:$0xff]   ;;  %v2290_v22 = vld [vmem:[%s2869_s3 + $0x38] ss:$12 sps:$4 sm:$0xff]  }
   0x8   :  { %459 = vmatprep.subr.bf16.mxu0 %v2200_v6  ;;  %1749 = vmatmul.mubr.msk.bf16.vlgmr.msra.gmra.mrb[0].mxu1 %vm107_vm0, %v1969_v9  ;;  %v1984_v23 = vld [vmem:[%s2868_s1 + $0x18] sm:$0xff]   ;;  %v2301_v24 = vld [vmem:[%s2869_s3 + $0x94] ss:$12 sps:$4 sm:$0xff]   ;;  %v58_v37 = vsub.s32 0, %v57_v36  ;;  %v62_v39 = vsub.s32 1, %v57_v36  ;;  %v66_v48 = vsub.s32 2, %v57_v36 }
   0x9   :  { %1757 = vmatpush3.bf16.msra.mxu1 %v2257_v17  ;;  %1752 = vmatprep.mubr.msk.bf16.mxu1 %vm107_vm0, %v1976_v14  ;;  %v2309_v25 = vld [vmem:[%s2869_s3 + $0x50] ss:$12 sps:$4 sm:$0xff]   ;;  %v2324_v27 = vld [vmem:[%s2869_s3 + $0xac] ss:$12 sps:$4 sm:$0xff]   ;;  %v2331_v28 = vld [vmem:[%s2869_s3 + $0x68] ss:$12 sps:$4 sm:$0xff]  }
   0xa   :  { %1758 = vmatprep.subr.bf16.mxu1 %v2881_v16  ;;  %v2317_v26 = vld [vmem:[%s2869_s3 + $0x90] ss:$12 sps:$4 sm:$0xff]   ;;  %v2337_v29 = vld [vmem:[%s2869_s3 + $0xa8] ss:$12 sps:$4 sm:$0xff]   ;;  %v2343_v30 = vld [vmem:[%s2870_s0] sm:$0xff] }
   0xb   :  { %460 = vmatpush1.bf16.msra.mxu0 %v2209_v7  ;;  %v328_v31 = vpack.c.bf16 %v2343_v30, %v2343_v30  ;;  %v2353_v32 = vld [vmem:[%s2869_s3 + $0x80] ss:$12 sps:$4 sm:$0xff]   ;;  %v2362_v33 = vld [vmem:[%s2869_s3 + $0x98] ss:$12 sps:$4 sm:$0xff]   ;;  %v2372_v34 = vld [vmem:[%s2869_s3 + $0xb0] ss:$12 sps:$4 sm:$0xff]  }
   0xc   :  { %461 = vmatprep.subr.bf16.mxu0 %v2216_v8  ;;  %v54_v38 = vld [vmem:[%s2871_s4] sm:$0x7] }
   0xd   :  { %1759 = vmatpush3.bf16.msra.mxu1 %v2264_v18  ;;  %v59_v41 = vrot.slane %v54_v38, %v58_v37  ;;  %v63_v43 = vrot.slane %v54_v38, %v62_v39  ;;  %v2417_v50 = vrot.slane %v54_v38, %v66_v48 }
   0xe   :  { %1585 = vmatmul.mubr.msk.bf16.gmra.mrb[4].mxu0 %vm107_vm0, %v1969_v9  ;;  %1760 = vmatprep.subr.bf16.mxu1 %v2881_v16 }
   0xf   :  { %462 = vmatpush1.bf16.msra.mxu0 %v2224_v10  ;;  %172 = vmatprep.mubr.bf16.mxu0 %v2879_v1 }
  0x10   :  { %463 = vmatprep.subr.bf16.mxu0 %v2234_v12  ;;  %1753 = vmatmul.mubr.msk.bf16.gmra.mrb[4].mxu1 %vm107_vm0, %v1984_v23 }
  0x11   :  { %1761 = vmatpush3.bf16.msra.mxu1 %v2290_v22  ;;  %1772 = vmatprep.mubr.msk.bf16.mxu1 %vm2121_vm1, %v2881_v16 }
  0x12   :  { %1762 = vmatprep.subr.bf16.mxu1 %v2881_v16 }
  0x13   :  { %464 = vmatpush1.bf16.msra.mxu0 %v2240_v13 }
  0x14   :  { %465 = vmatprep.subr.bf16.mxu0 %v2250_v15 }
  0x15   :  { %1763 = vmatpush3.bf16.msra.mxu1 %v2309_v25 }
  0x16   :  { %1586 = vmatmul.mubr.msk.bf16.gmra.mrb[8].mxu0 %vm107_vm0, %v1976_v14  ;;  %1764 = vmatprep.subr.bf16.mxu1 %v2881_v16 }
  0x17   :  { %466 = vmatpush1.bf16.msra.mxu0 %v2271_v19  ;;  %182 = vmatprep.mubr.bf16.mxu0 %v2879_v1 }
  0x18   :  { %467 = vmatprep.subr.bf16.mxu0 %v2278_v20 }
  0x19   :  { %1765 = vmatpush3.bf16.msra.mxu1 %v2331_v28 }
  0x1a   :  { %1766 = vmatprep.subr.bf16.mxu1 %v2881_v16 }
  0x1b   :  { %468 = vmatpush1.bf16.msra.mxu0 %v2283_v21 }
  0x1c   :  { %469 = vmatprep.subr.bf16.mxu0 %v2301_v24 }
  0x1d   :  { %1767 = vmatpush3.bf16.msra.mxu1 %v2353_v32 }
  0x1e   :  { %1587 = vmatmul.mubr.msk.bf16.gmra.mrb[12].mxu0 %vm107_vm0, %v1984_v23  ;;  %1768 = vmatprep.subr.bf16.mxu1 %v2881_v16 }
  0x1f   :  { %470 = vmatpush1.bf16.msra.mxu0 %v2317_v26  ;;  %489 = vmatprep.mubr.bf16.mxu0 %v2879_v1 }
  0x20   :  { %471 = vmatprep.subr.bf16.mxu0 %v2324_v27 }
  0x21   :  { %1769 = vmatpush3.bf16.msra.mxu1 %v2362_v33 }
  0x22   :  { %1770 = vmatprep.subr.bf16.mxu1 %v2881_v16 }
  0x23   :  { %472 = vmatpush1.bf16.msra.mxu0 %v2337_v29 }
  0x24   :  { %566 = vmatprep.subr.bf16.mxu0 %v2190_v4 }
  0x25   :  { %1771 = vmatpush3.bf16.msra.mxu1 %v2372_v34 }
  0x26   :  { %490 = vmatmul.mubr.bf16.vlgmr.msra.gmra.mrb[16].mxu0 %v328_v31  ;;  %1776 = vmatprep.subr.bf16.mxu1 %v2881_v16 }
  0x27   :  { %567 = vmatpush1.bf16.msra.mxu0 %v2195_v5  ;;  %598 = vmatprep.mubr.bf16.mxu0 %v2879_v1 }
  0x28   :  { %568 = vmatprep.subr.bf16.mxu0 %v2200_v6  ;;  %1773 = vmatmul.mubr.bf16.vlgmr.msra.gmra.mrb[8].mxu1 %v328_v31 }
  0x29   :  { %1777 = vmatpush3.bf16.msra.mxu1 %v2257_v17  ;;  %1792 = vmatprep.mubr.msk.bf16.mxu1 %vm2121_vm1, %v2881_v16 }
  0x2a   :  { %1778 = vmatprep.subr.bf16.mxu1 %v2881_v16 }
  0x2b   :  { %569 = vmatpush1.bf16.msra.mxu0 %v2209_v7 }
  0x2c   :  { %570 = vmatprep.subr.bf16.mxu0 %v2216_v8 }
  0x2d   :  { %1779 = vmatpush3.bf16.msra.mxu1 %v2264_v18 }
  0x2e   :  { %1780 = vmatprep.subr.bf16.mxu1 %v2881_v16 }
  0x2f   :  { %571 = vmatpush1.bf16.msra.mxu0 %v2224_v10 }
  0x30   :  { %572 = vmatprep.subr.bf16.mxu0 %v2234_v12 }
  0x31   :  { %1781 = vmatpush3.bf16.msra.mxu1 %v2290_v22 }
  0x32   :  { %1782 = vmatprep.subr.bf16.mxu1 %v2881_v16 }
  0x33   :  { %573 = vmatpush1.bf16.msra.mxu0 %v2240_v13 }
  0x34   :  { %574 = vmatprep.subr.bf16.mxu0 %v2250_v15 }
  0x35   :  { %1783 = vmatpush3.bf16.msra.mxu1 %v2309_v25 }
  0x36   :  { %1784 = vmatprep.subr.bf16.mxu1 %v2881_v16 }
  0x37   :  { %575 = vmatpush1.bf16.msra.mxu0 %v2271_v19 }
  0x38   :  { %576 = vmatprep.subr.bf16.mxu0 %v2278_v20 }
  0x39   :  { %1785 = vmatpush3.bf16.msra.mxu1 %v2331_v28 }
  0x3a   :  { %1786 = vmatprep.subr.bf16.mxu1 %v2881_v16 }
  0x3b   :  { %577 = vmatpush1.bf16.msra.mxu0 %v2283_v21 }
  0x3c   :  { %578 = vmatprep.subr.bf16.mxu0 %v2301_v24 }
  0x3d   :  { %1787 = vmatpush3.bf16.msra.mxu1 %v2353_v32 }
  0x3e   :  { %1788 = vmatprep.subr.bf16.mxu1 %v2881_v16 }
  0x3f   :  { %579 = vmatpush1.bf16.msra.mxu0 %v2317_v26 }
  0x40   :  { %580 = vmatprep.subr.bf16.mxu0 %v2324_v27 }
  0x41   :  { %1789 = vmatpush3.bf16.msra.mxu1 %v2362_v33 }
  0x42   :  { %1790 = vmatprep.subr.bf16.mxu1 %v2881_v16 }
  0x43   :  { %581 = vmatpush1.bf16.msra.mxu0 %v2337_v29 }
  0x44   :  { %675 = vmatprep.subr.bf16.mxu0 %v2190_v4 }
  0x45   :  { %1791 = vmatpush3.bf16.msra.mxu1 %v2372_v34 }
  0x46   :  { %1796 = vmatprep.subr.bf16.mxu1 %v2881_v16 }
  0xd9   :  { %v154_v40 = vpop.f32.mrb[0].mxu0 }
  0xda   :  { %v156_v42 = vpop.f32.mrb[1].mxu0 }
  0xdb   :  { %v158_v44 = vpop.f32.mrb[2].mxu0  ;;  %v1750_v57 = vpop.f32.mrb[0].mxu1 }
  0xdc   :  { %v2413_v45 = vadd.f32 %v158_v44, %v59_v41  ;;  %v160_v46 = vpop.f32.mrb[3].mxu0  ;;  %v2428_v59 = vadd.f32 %v1750_v57, %v2417_v50  ;;  %v227_v60 = vpop.f32.mrb[1].mxu1 }
  0xdd   :  { %v2415_v47 = vadd.f32 %v160_v46, %v63_v43  ;;  %v1751_v61 = vpop.f32.mrb[2].mxu1 }
  0xde   :  { %v2431_v62 = vadd.f32 %v1751_v61, %v2417_v50  ;;  %v230_v63 = vpop.f32.mrb[3].mxu1 }
  0xdf   :  { %v2434_v0 = vadd.f32 %v230_v63, %v2417_v50 }
  0xe1   :  { %v164_v49 = vpop.f32.mrb[4].mxu0 }
  0xe2   :  { %v2419_v51 = vadd.f32 %v164_v49, %v59_v41  ;;  %v166_v52 = vpop.f32.mrb[5].mxu0 }
  0xe3   :  { %v2421_v53 = vadd.f32 %v166_v52, %v63_v43  ;;  %v168_v54 = vpop.f32.mrb[6].mxu0  ;;  %v1754_v36 = vpop.f32.mrb[4].mxu1 }
  0xe4   :  { %v2423_v55 = vadd.f32 %v168_v54, %v59_v41  ;;  %v170_v56 = vpop.f32.mrb[7].mxu0  ;;  %v2445_v38 = vadd.f32 %v1754_v36, %v2417_v50  ;;  %v243_v39 = vpop.f32.mrb[5].mxu1  ;;  %v157_v36 = vadd.f32 %v156_v42, %v63_v43 }
  0xe5   :  { %v2425_v58 = vadd.f32 %v170_v56, %v63_v43  ;;  %v2448_v44 = vadd.f32 %v243_v39, %v2417_v50  ;;  %v1755_v46 = vpop.f32.mrb[6].mxu1 }
  0xe6   :  { %2883 = vst [vmem:[#allocation4_spill] sm:$0xff] %v2445_v38  ;;  %v2451_v48 = vadd.f32 %v1755_v46, %v2417_v50  ;;  %v246_v49 = vpop.f32.mrb[7].mxu1 }
  0xe7   :  { %v2454_v52 = vadd.f32 %v246_v49, %v2417_v50 }
  0xe8   :  { %2884 = vst [vmem:[#allocation5_spill] sm:$0xff] %v2451_v48 }
  0xe9   :  { %v174_v2 = vpop.f32.mrb[8].mxu0 }
  0xea   :  { %v2436_v3 = vadd.f32 %v174_v2, %v59_v41  ;;  %v176_v9 = vpop.f32.mrb[9].mxu0 }
  0xeb   :  { %v2438_v11 = vadd.f32 %v176_v9, %v63_v43  ;;  %v178_v14 = vpop.f32.mrb[10].mxu0 }
  0xec   :  { %v2440_v23 = vadd.f32 %v178_v14, %v59_v41  ;;  %v180_v31 = vpop.f32.mrb[11].mxu0 }
  0xed   :  { %v2442_v37 = vadd.f32 %v180_v31, %v63_v43  ;;  %v155_v31 = vadd.f32 %v154_v40, %v59_v41  ;;  %v2467_v40 = vld [vmem:[%s2872_s5] ss:$0 sm:$0xff] }
  0xf1   :  { %v184_v54 = vpop.f32.mrb[12].mxu0 }
  0xf2   :  { %v2456_v56 = vadd.f32 %v184_v54, %v59_v41  ;;  %v186_v57 = vpop.f32.mrb[13].mxu0 }
  0xf3   :  { %v2458_v61 = vadd.f32 %v186_v57, %v63_v43  ;;  %v188_v63 = vpop.f32.mrb[14].mxu0 }
  0xf4   :  { %2885 = vst [vmem:[#allocation6_spill] sm:$0xff] %v2456_v56  ;;  %v2460_v2 = vadd.f32 %v188_v63, %v59_v41  ;;  %v190_v9 = vpop.f32.mrb[15].mxu0 }
  0xf5   :  { %2886 = vst [vmem:[#allocation7_spill] sm:$0xff] %v2458_v61  ;;  %v2462_v14 = vadd.f32 %v190_v9, %v63_v43 }
  0xf6   :  { %2887 = vst [vmem:[#allocation8_spill] sm:$0xff] %v2460_v2 }
  0xf9   :  { %v491_v39 = vpop.f32.mrb[16].mxu0 }
  0xfa   :  { %v538_v46 = vadd.f32 %v491_v39, %v155_v31  ;;  %v493_v35 = vpop.f32.mrb[17].mxu0 }
  0xfb   :  { %v545_v1 = vadd.f32 %v493_v35, %v157_v36  ;;  %v495_v49 = vpop.f32.mrb[18].mxu0  ;;  %v532_v54 = vpop.f32.mrb[8].mxu1 }
  0xfc   :  { %v1617_v16 = vmul.f32 -1.442695, %v538_v46  ;;  %v496_v48 = vpop.f32.mrb[19].mxu0  ;;  %v1774_v38 = vpop.f32.mrb[9].mxu1  ;;  %v552_v35 = vadd.f32 %v2467_v40, %v532_v54 }
  0xfd   :  { %v1618_v57 = vmul.f32 -1.442695, %v545_v1  ;;  %v535_v61 = vpop.f32.mrb[10].mxu1 }
  0xfe   :  { %2015 = vpow2.f32 %v1617_v16  ;;  %v1775_v56 = vpop.f32.mrb[11].mxu1  ;;  %v228_v16 = vadd.f32 %v227_v60, %v2417_v50  ;;  %v2888_v50 = vmov 0.0   ;;  %v2889_v60 = vmov 0  }
  0xff   :  { %2017 = vpow2.f32 %v1618_v57 }
 0x108   :  { %v2016_v63 = vpop.eup %2015 }
 0x109   :  { %v542_v2 = vadd.f32 1.0, %v2016_v63  ;;  %v2018_v41 = vpop.eup %2017 }
 0x10a   :  { %v549_v38 = vadd.f32 1.0, %v2018_v41 }
 0x10b   :  { %2019 = vrcp.f32 %v542_v2 }
 0x115   :  { %v2020_v42 = vpop.eup %2019 }
 0x116   :  { %v553_v43 = vmul.f32 %v2020_v42, %v552_v35 }
 0x118   :  { %v554_v1 = vadd.f32 %v553_v43, %v228_v16 }
 0x11a   :  { %2021 = vtanh.f32 %v554_v1 }
 0x11b   :  { %2023 = vrcp.f32 %v549_v38 }
 0x124   :  { %v2022_v48 = vpop.eup %2021 }
 0x125   :  { %v556_v56 = vsub.f32 %v2343_v30, %v2022_v48  ;;  %v2024_v61 = vpop.eup %2023 }
 0x127   :  { %v557_v2 = vmul.f32 %v2024_v61, %v556_v56 }
 0x129   :  { %v2472_v9 = vadd.f32 %v2022_v48, %v557_v2 }
 0x12b   :  { %v565_v31 = vpack.c.bf16 %v2472_v9, %v2472_v9 }
 0x12d   :  { %599 = vmatmul.mubr.bf16.vlgmr.msra.gmra.mrb[20].mxu0 %v565_v31  ;;  %1793 = vmatmul.mubr.bf16.vlgmr.msra.gmra.mrb[12].mxu1 %v565_v31 }
 0x12e   :  { %676 = vmatpush1.bf16.msra.mxu0 %v2195_v5  ;;  %1797 = vmatpush3.bf16.msra.mxu1 %v2257_v17 }
 0x12f   :  { %677 = vmatprep.subr.bf16.mxu0 %v2200_v6  ;;  %1798 = vmatprep.subr.bf16.mxu1 %v2888_v50 }
 0x130   :  { %707 = vmatprep.mubr.bf16.mxu0 %v2889_v60  ;;  %1812 = vmatprep.mubr.msk.bf16.mxu1 %vm2121_vm1, %v2888_v50 }
 0x132   :  { %678 = vmatpush1.bf16.msra.mxu0 %v2209_v7  ;;  %1799 = vmatpush3.bf16.msra.mxu1 %v2264_v18 }
 0x133   :  { %679 = vmatprep.subr.bf16.mxu0 %v2216_v8  ;;  %1800 = vmatprep.subr.bf16.mxu1 %v2888_v50 }
 0x136   :  { %680 = vmatpush1.bf16.msra.mxu0 %v2224_v10  ;;  %1801 = vmatpush3.bf16.msra.mxu1 %v2290_v22 }
 0x137   :  { %681 = vmatprep.subr.bf16.mxu0 %v2234_v12  ;;  %1802 = vmatprep.subr.bf16.mxu1 %v2888_v50 }
 0x13a   :  { %682 = vmatpush1.bf16.msra.mxu0 %v2240_v13  ;;  %1803 = vmatpush3.bf16.msra.mxu1 %v2309_v25 }
 0x13b   :  { %683 = vmatprep.subr.bf16.mxu0 %v2250_v15  ;;  %1804 = vmatprep.subr.bf16.mxu1 %v2888_v50 }
 0x13e   :  { %684 = vmatpush1.bf16.msra.mxu0 %v2271_v19  ;;  %1805 = vmatpush3.bf16.msra.mxu1 %v2331_v28 }
 0x13f   :  { %685 = vmatprep.subr.bf16.mxu0 %v2278_v20  ;;  %1806 = vmatprep.subr.bf16.mxu1 %v2888_v50 }
 0x142   :  { %686 = vmatpush1.bf16.msra.mxu0 %v2283_v21  ;;  %1807 = vmatpush3.bf16.msra.mxu1 %v2353_v32 }
 0x143   :  { %687 = vmatprep.subr.bf16.mxu0 %v2301_v24  ;;  %1808 = vmatprep.subr.bf16.mxu1 %v2888_v50 }
 0x146   :  { %688 = vmatpush1.bf16.msra.mxu0 %v2317_v26  ;;  %1809 = vmatpush3.bf16.msra.mxu1 %v2362_v33 }
 0x147   :  { %689 = vmatprep.subr.bf16.mxu0 %v2324_v27  ;;  %1810 = vmatprep.subr.bf16.mxu1 %v2888_v50 }
 0x14a   :  { %690 = vmatpush1.bf16.msra.mxu0 %v2337_v29  ;;  %1811 = vmatpush3.bf16.msra.mxu1 %v2372_v34 }
 0x14b   :  { %784 = vmatprep.subr.bf16.mxu0 %v2190_v4  ;;  %1816 = vmatprep.subr.bf16.mxu1 %v2888_v50 }
 0x200   :  { %v600_v30 = vpop.f32.mrb[20].mxu0  ;;  %v641_v36 = vpop.f32.mrb[12].mxu1 }
 0x201   :  { %v647_v39 = vadd.f32 %v600_v30, %v2413_v45  ;;  %v602_v46 = vpop.f32.mrb[21].mxu0  ;;  %v1794_v49 = vpop.f32.mrb[13].mxu1  ;;  %v661_v48 = vadd.f32 %v2467_v40, %v641_v36 }
 0x202   :  { %v654_v54 = vadd.f32 %v602_v46, %v2415_v47  ;;  %v604_v57 = vpop.f32.mrb[22].mxu0  ;;  %v644_v63 = vpop.f32.mrb[14].mxu1 }
 0x203   :  { %v1619_v35 = vmul.f32 -1.442695, %v647_v39  ;;  %v605_v41 = vpop.f32.mrb[23].mxu0  ;;  %v1795_v42 = vpop.f32.mrb[15].mxu1 }
 0x204   :  { %v1620_v16 = vmul.f32 -1.442695, %v654_v54 }
 0x205   :  { %2025 = vpow2.f32 %v1619_v35 }
 0x206   :  { %2027 = vpow2.f32 %v1620_v16 }
 0x20f   :  { %v2026_v43 = vpop.eup %2025 }
 0x210   :  { %v651_v38 = vadd.f32 1.0, %v2026_v43  ;;  %v2028_v1 = vpop.eup %2027 }
 0x211   :  { %v658_v2 = vadd.f32 1.0, %v2028_v1 }
 0x212   :  { %2029 = vrcp.f32 %v651_v38 }
 0x21c   :  { %v2030_v56 = vpop.eup %2029 }
 0x21d   :  { %v662_v45 = vmul.f32 %v2030_v56, %v661_v48 }
 0x21f   :  { %v663_v61 = vadd.f32 %v662_v45, %v2434_v0 }
 0x221   :  { %2031 = vtanh.f32 %v663_v61 }
 0x222   :  { %2033 = vrcp.f32 %v658_v2 }
 0x22b   :  { %v2032_v47 = vpop.eup %2031 }
 0x22c   :  { %v665_v31 = vsub.f32 %v2472_v9, %v2032_v47  ;;  %v2034_v30 = vpop.eup %2033 }
 0x22e   :  { %v666_v39 = vmul.f32 %v2034_v30, %v665_v31 }
 0x230   :  { %v2516_v46 = vadd.f32 %v2032_v47, %v666_v39 }
 0x232   :  { %v674_v49 = vpack.c.bf16 %v2516_v46, %v2516_v46 }
 0x234   :  { %708 = vmatmul.mubr.bf16.vlgmr.msra.gmra.mrb[24].mxu0 %v674_v49  ;;  %1813 = vmatmul.mubr.bf16.vlgmr.msra.gmra.mrb[16].mxu1 %v674_v49 }
 0x235   :  { %785 = vmatpush1.bf16.msra.mxu0 %v2195_v5  ;;  %1817 = vmatpush3.bf16.msra.mxu1 %v2257_v17 }
 0x236   :  { %786 = vmatprep.subr.bf16.mxu0 %v2200_v6  ;;  %1818 = vmatprep.subr.bf16.mxu1 %v2888_v50 }
 0x237   :  { %816 = vmatprep.mubr.bf16.mxu0 %v2889_v60  ;;  %1832 = vmatprep.mubr.msk.bf16.mxu1 %vm2121_vm1, %v2888_v50 }
 0x239   :  { %787 = vmatpush1.bf16.msra.mxu0 %v2209_v7  ;;  %1819 = vmatpush3.bf16.msra.mxu1 %v2264_v18 }
 0x23a   :  { %788 = vmatprep.subr.bf16.mxu0 %v2216_v8  ;;  %1820 = vmatprep.subr.bf16.mxu1 %v2888_v50 }
 0x23d   :  { %789 = vmatpush1.bf16.msra.mxu0 %v2224_v10  ;;  %1821 = vmatpush3.bf16.msra.mxu1 %v2290_v22 }
 0x23e   :  { %790 = vmatprep.subr.bf16.mxu0 %v2234_v12  ;;  %1822 = vmatprep.subr.bf16.mxu1 %v2888_v50 }
 0x241   :  { %791 = vmatpush1.bf16.msra.mxu0 %v2240_v13  ;;  %1823 = vmatpush3.bf16.msra.mxu1 %v2309_v25 }
 0x242   :  { %792 = vmatprep.subr.bf16.mxu0 %v2250_v15  ;;  %1824 = vmatprep.subr.bf16.mxu1 %v2888_v50 }
 0x245   :  { %793 = vmatpush1.bf16.msra.mxu0 %v2271_v19  ;;  %1825 = vmatpush3.bf16.msra.mxu1 %v2331_v28 }
 0x246   :  { %794 = vmatprep.subr.bf16.mxu0 %v2278_v20  ;;  %1826 = vmatprep.subr.bf16.mxu1 %v2888_v50 }
 0x249   :  { %795 = vmatpush1.bf16.msra.mxu0 %v2283_v21  ;;  %1827 = vmatpush3.bf16.msra.mxu1 %v2353_v32 }
 0x24a   :  { %796 = vmatprep.subr.bf16.mxu0 %v2301_v24  ;;  %1828 = vmatprep.subr.bf16.mxu1 %v2888_v50 }
 0x24d   :  { %797 = vmatpush1.bf16.msra.mxu0 %v2317_v26  ;;  %1829 = vmatpush3.bf16.msra.mxu1 %v2362_v33 }
 0x24e   :  { %798 = vmatprep.subr.bf16.mxu0 %v2324_v27  ;;  %1830 = vmatprep.subr.bf16.mxu1 %v2888_v50 }
 0x251   :  { %799 = vmatpush1.bf16.msra.mxu0 %v2337_v29  ;;  %1831 = vmatpush3.bf16.msra.mxu1 %v2372_v34 }
 0x252   :  { %893 = vmatprep.subr.bf16.mxu0 %v2190_v4  ;;  %1836 = vmatprep.subr.bf16.mxu1 %v2888_v50 }
 0x307   :  { %v709_v0 = vpop.f32.mrb[24].mxu0  ;;  %v750_v9 = vpop.f32.mrb[16].mxu1 }
 0x308   :  { %v756_v36 = vadd.f32 %v709_v0, %v2419_v51  ;;  %v711_v54 = vpop.f32.mrb[25].mxu0  ;;  %v1814_v57 = vpop.f32.mrb[17].mxu1  ;;  %v770_v45 = vadd.f32 %v2467_v40, %v750_v9 }
 0x309   :  { %v763_v63 = vadd.f32 %v711_v54, %v2421_v53  ;;  %v713_v35 = vpop.f32.mrb[26].mxu0  ;;  %v753_v41 = vpop.f32.mrb[18].mxu1 }
 0x30a   :  { %v1621_v42 = vmul.f32 -1.442695, %v756_v36  ;;  %v714_v16 = vpop.f32.mrb[27].mxu0  ;;  %v1815_v43 = vpop.f32.mrb[19].mxu1 }
 0x30b   :  { %v1622_v38 = vmul.f32 -1.442695, %v763_v63 }
 0x30c   :  { %2035 = vpow2.f32 %v1621_v42 }
 0x30d   :  { %2037 = vpow2.f32 %v1622_v38 }
 0x316   :  { %v2036_v1 = vpop.eup %2035 }
 0x317   :  { %v760_v48 = vadd.f32 1.0, %v2036_v1  ;;  %v2038_v56 = vpop.eup %2037 }
 0x318   :  { %v767_v47 = vadd.f32 1.0, %v2038_v56 }
 0x319   :  { %2039 = vrcp.f32 %v760_v48 }
 0x323   :  { %v2040_v61 = vpop.eup %2039 }
 0x324   :  { %v771_v51 = vmul.f32 %v2040_v61, %v770_v45 }
 0x326   :  { %v772_v2 = vadd.f32 %v771_v51, %v2428_v59 }
 0x328   :  { %2041 = vtanh.f32 %v772_v2 }
 0x329   :  { %2043 = vrcp.f32 %v767_v47 }
 0x332   :  { %v2042_v53 = vpop.eup %2041 }
 0x333   :  { %v774_v31 = vsub.f32 %v2516_v46, %v2042_v53  ;;  %v2044_v30 = vpop.eup %2043 }
 0x335   :  { %v775_v39 = vmul.f32 %v2044_v30, %v774_v31 }
 0x337   :  { %v2560_v49 = vadd.f32 %v2042_v53, %v775_v39 }
 0x339   :  { %v783_v0 = vpack.c.bf16 %v2560_v49, %v2560_v49 }
 0x33b   :  { %817 = vmatmul.mubr.bf16.vlgmr.msra.gmra.mrb[28].mxu0 %v783_v0  ;;  %1833 = vmatmul.mubr.bf16.vlgmr.msra.gmra.mrb[20].mxu1 %v783_v0 }
 0x33c   :  { %894 = vmatpush1.bf16.msra.mxu0 %v2195_v5  ;;  %1837 = vmatpush3.bf16.msra.mxu1 %v2257_v17 }
 0x33d   :  { %895 = vmatprep.subr.bf16.mxu0 %v2200_v6  ;;  %1838 = vmatprep.subr.bf16.mxu1 %v2888_v50 }
 0x33e   :  { %925 = vmatprep.mubr.bf16.mxu0 %v2889_v60  ;;  %1852 = vmatprep.mubr.msk.bf16.mxu1 %vm2121_vm1, %v2888_v50 }
 0x340   :  { %896 = vmatpush1.bf16.msra.mxu0 %v2209_v7  ;;  %1839 = vmatpush3.bf16.msra.mxu1 %v2264_v18 }
 0x341   :  { %897 = vmatprep.subr.bf16.mxu0 %v2216_v8  ;;  %1840 = vmatprep.subr.bf16.mxu1 %v2888_v50 }
 0x344   :  { %898 = vmatpush1.bf16.msra.mxu0 %v2224_v10  ;;  %1841 = vmatpush3.bf16.msra.mxu1 %v2290_v22 }
 0x345   :  { %899 = vmatprep.subr.bf16.mxu0 %v2234_v12  ;;  %1842 = vmatprep.subr.bf16.mxu1 %v2888_v50 }
 0x348   :  { %900 = vmatpush1.bf16.msra.mxu0 %v2240_v13  ;;  %1843 = vmatpush3.bf16.msra.mxu1 %v2309_v25 }
 0x349   :  { %901 = vmatprep.subr.bf16.mxu0 %v2250_v15  ;;  %1844 = vmatprep.subr.bf16.mxu1 %v2888_v50 }
 0x34c   :  { %902 = vmatpush1.bf16.msra.mxu0 %v2271_v19  ;;  %1845 = vmatpush3.bf16.msra.mxu1 %v2331_v28 }
 0x34d   :  { %903 = vmatprep.subr.bf16.mxu0 %v2278_v20  ;;  %1846 = vmatprep.subr.bf16.mxu1 %v2888_v50 }
 0x350   :  { %904 = vmatpush1.bf16.msra.mxu0 %v2283_v21  ;;  %1847 = vmatpush3.bf16.msra.mxu1 %v2353_v32 }
 0x351   :  { %905 = vmatprep.subr.bf16.mxu0 %v2301_v24  ;;  %1848 = vmatprep.subr.bf16.mxu1 %v2888_v50 }
 0x354   :  { %906 = vmatpush1.bf16.msra.mxu0 %v2317_v26  ;;  %1849 = vmatpush3.bf16.msra.mxu1 %v2362_v33 }
 0x355   :  { %907 = vmatprep.subr.bf16.mxu0 %v2324_v27  ;;  %1850 = vmatprep.subr.bf16.mxu1 %v2888_v50 }
 0x358   :  { %908 = vmatpush1.bf16.msra.mxu0 %v2337_v29  ;;  %1851 = vmatpush3.bf16.msra.mxu1 %v2372_v34 }
 0x359   :  { %1002 = vmatprep.subr.bf16.mxu0 %v2190_v4  ;;  %1856 = vmatprep.subr.bf16.mxu1 %v2888_v50 }
 0x40e   :  { %v818_v59 = vpop.f32.mrb[28].mxu0  ;;  %v859_v46 = vpop.f32.mrb[20].mxu1 }
 0x40f   :  { %v865_v9 = vadd.f32 %v818_v59, %v2423_v55  ;;  %v820_v36 = vpop.f32.mrb[29].mxu0  ;;  %v1834_v54 = vpop.f32.mrb[21].mxu1  ;;  %v879_v56 = vadd.f32 %v2467_v40, %v859_v46 }
 0x410   :  { %v872_v57 = vadd.f32 %v820_v36, %v2425_v58  ;;  %v822_v63 = vpop.f32.mrb[30].mxu0  ;;  %v862_v35 = vpop.f32.mrb[22].mxu1 }
 0x411   :  { %v1623_v41 = vmul.f32 -1.442695, %v865_v9  ;;  %v823_v42 = vpop.f32.mrb[31].mxu0  ;;  %v1835_v16 = vpop.f32.mrb[23].mxu1 }
 0x412   :  { %v1624_v43 = vmul.f32 -1.442695, %v872_v57 }
 0x413   :  { %2045 = vpow2.f32 %v1623_v41 }
 0x414   :  { %2047 = vpow2.f32 %v1624_v43 }
 0x41d   :  { %v2046_v38 = vpop.eup %2045 }
 0x41e   :  { %v869_v1 = vadd.f32 1.0, %v2046_v38  ;;  %v2048_v48 = vpop.eup %2047 }
 0x41f   :  { %v876_v51 = vadd.f32 1.0, %v2048_v48 }
 0x420   :  { %2049 = vrcp.f32 %v869_v1 }
 0x42a   :  { %v2050_v45 = vpop.eup %2049 }
 0x42b   :  { %v880_v55 = vmul.f32 %v2050_v45, %v879_v56 }
 0x42d   :  { %v881_v61 = vadd.f32 %v880_v55, %v2431_v62  ;;  %v2655_v55 = vld [vmem:[%s2869_s3] ss:$12 sps:$4 sm:$0xff]  }
 0x42f   :  { %2051 = vtanh.f32 %v881_v61 }
 0x430   :  { %2053 = vrcp.f32 %v876_v51 }
 0x439   :  { %v2052_v58 = vpop.eup %2051 }
 0x43a   :  { %v883_v2 = vsub.f32 %v2560_v49, %v2052_v58  ;;  %v2054_v47 = vpop.eup %2053 }
 0x43c   :  { %v884_v53 = vmul.f32 %v2054_v47, %v883_v2 }
 0x43e   :  { %v2604_v31 = vadd.f32 %v2052_v58, %v884_v53 }
 0x440   :  { %v892_v30 = vpack.c.bf16 %v2604_v31, %v2604_v31 }
 0x442   :  { %926 = vmatmul.mubr.bf16.vlgmr.msra.gmra.mrb[32].mxu0 %v892_v30  ;;  %1853 = vmatmul.mubr.bf16.vlgmr.msra.gmra.mrb[24].mxu1 %v892_v30 }
 0x443   :  { %1003 = vmatpush1.bf16.msra.mxu0 %v2195_v5  ;;  %1857 = vmatpush3.bf16.msra.mxu1 %v2257_v17 }
 0x444   :  { %1004 = vmatprep.subr.bf16.mxu0 %v2200_v6  ;;  %1858 = vmatprep.subr.bf16.mxu1 %v2888_v50 }
 0x445   :  { %1034 = vmatprep.mubr.bf16.mxu0 %v2889_v60  ;;  %1872 = vmatprep.mubr.msk.bf16.mxu1 %vm2121_vm1, %v2888_v50 }
 0x447   :  { %1005 = vmatpush1.bf16.msra.mxu0 %v2209_v7  ;;  %1859 = vmatpush3.bf16.msra.mxu1 %v2264_v18 }
 0x448   :  { %1006 = vmatprep.subr.bf16.mxu0 %v2216_v8  ;;  %1860 = vmatprep.subr.bf16.mxu1 %v2888_v50 }
 0x44b   :  { %1007 = vmatpush1.bf16.msra.mxu0 %v2224_v10  ;;  %1861 = vmatpush3.bf16.msra.mxu1 %v2290_v22 }
 0x44c   :  { %1008 = vmatprep.subr.bf16.mxu0 %v2234_v12  ;;  %1862 = vmatprep.subr.bf16.mxu1 %v2888_v50 }
 0x44f   :  { %1009 = vmatpush1.bf16.msra.mxu0 %v2240_v13  ;;  %1863 = vmatpush3.bf16.msra.mxu1 %v2309_v25 }
 0x450   :  { %1010 = vmatprep.subr.bf16.mxu0 %v2250_v15  ;;  %1864 = vmatprep.subr.bf16.mxu1 %v2888_v50 }
 0x453   :  { %1011 = vmatpush1.bf16.msra.mxu0 %v2271_v19  ;;  %1865 = vmatpush3.bf16.msra.mxu1 %v2331_v28 }
 0x454   :  { %1012 = vmatprep.subr.bf16.mxu0 %v2278_v20  ;;  %1866 = vmatprep.subr.bf16.mxu1 %v2888_v50 }
 0x457   :  { %1013 = vmatpush1.bf16.msra.mxu0 %v2283_v21  ;;  %1867 = vmatpush3.bf16.msra.mxu1 %v2353_v32 }
 0x458   :  { %1014 = vmatprep.subr.bf16.mxu0 %v2301_v24  ;;  %1868 = vmatprep.subr.bf16.mxu1 %v2888_v50 }
 0x45b   :  { %1015 = vmatpush1.bf16.msra.mxu0 %v2317_v26  ;;  %1869 = vmatpush3.bf16.msra.mxu1 %v2362_v33 }
 0x45c   :  { %1016 = vmatprep.subr.bf16.mxu0 %v2324_v27  ;;  %1870 = vmatprep.subr.bf16.mxu1 %v2888_v50 }
 0x45f   :  { %1017 = vmatpush1.bf16.msra.mxu0 %v2337_v29  ;;  %1871 = vmatpush3.bf16.msra.mxu1 %v2372_v34 }
 0x460   :  { %1111 = vmatprep.subr.bf16.mxu0 %v2190_v4  ;;  %1876 = vmatprep.subr.bf16.mxu1 %v2888_v50 }
 0x515   :  { %v927_v5 = vpop.f32.mrb[32].mxu0  ;;  %v968_v6 = vpop.f32.mrb[24].mxu1 }
 0x516   :  { %v974_v62 = vadd.f32 %v927_v5, %v2436_v3  ;;  %v929_v39 = vpop.f32.mrb[33].mxu0  ;;  %v1854_v49 = vpop.f32.mrb[25].mxu1  ;;  %v988_v41 = vadd.f32 %v2467_v40, %v968_v6  ;;  %v2103_v6 = vld [vmem:[%s2869_s3 + $0x18] ss:$12 sps:$4 sm:$0xff]  }
 0x517   :  { %v981_v0 = vadd.f32 %v929_v39, %v2438_v11  ;;  %v931_v59 = vpop.f32.mrb[34].mxu0  ;;  %v971_v46 = vpop.f32.mrb[26].mxu1  ;;  %v2105_v39 = vld [vmem:[%s2869_s3 + $0x34] ss:$12 sps:$4 sm:$0xff]   ;;  %v2107_v49 = vld [vmem:[%s2869_s3 + $0x38] ss:$12 sps:$4 sm:$0xff]  }
 0x518   :  { %v1625_v9 = vmul.f32 -1.442695, %v974_v62  ;;  %v932_v36 = vpop.f32.mrb[35].mxu0  ;;  %v1855_v54 = vpop.f32.mrb[27].mxu1  ;;  %v2104_v62 = vld [vmem:[%s2869_s3 + $0x20] ss:$12 sps:$4 sm:$0xff]  }
 0x519   :  { %v1626_v57 = vmul.f32 -1.442695, %v981_v0  ;;  %v2108_v0 = vld [vmem:[%s2869_s3 + $0x4c] ss:$12 sps:$4 sm:$0xff]   ;;  %v2109_v59 = vld [vmem:[%s2869_s3 + $0x48] ss:$12 sps:$4 sm:$0xff]  }
 0x51a   :  { %2055 = vpow2.f32 %v1625_v9  ;;  %v2110_v46 = vld [vmem:[%s2869_s3 + $0x64] ss:$12 sps:$4 sm:$0xff]   ;;  %v2111_v9 = vld [vmem:[%s2869_s3 + $0x60] ss:$12 sps:$4 sm:$0xff]   ;;  %v2112_v36 = vld [vmem:[%s2869_s3 + $0x7c] ss:$12 sps:$4 sm:$0xff]  }
 0x51b   :  { %2057 = vpow2.f32 %v1626_v57  ;;  %v2114_v54 = vld [vmem:[%s2869_s3 + $0x94] ss:$12 sps:$4 sm:$0xff]   ;;  %v2116_v57 = vld [vmem:[%s2869_s3 + $0xac] ss:$12 sps:$4 sm:$0xff]  }
 0x524   :  { %v2056_v63 = vpop.eup %2055 }
 0x525   :  { %v978_v35 = vadd.f32 1.0, %v2056_v63  ;;  %v2058_v4 = vpop.eup %2057 }
 0x526   :  { %v985_v43 = vadd.f32 1.0, %v2058_v4 }
 0x527   :  { %2059 = vrcp.f32 %v978_v35  ;;  %v2890_v35 = vld [vmem:[#allocation6_spill] sm:$0xff] }
 0x531   :  { %v2060_v42 = vpop.eup %2059 }
 0x532   :  { %v989_v3 = vmul.f32 %v2060_v42, %v988_v41 }
 0x534   :  { %v990_v16 = vadd.f32 %v989_v3, %v2448_v44  ;;  %v2662_v44 = vld [vmem:[%s2869_s3 + $0x1c] ss:$12 sps:$4 sm:$0xff]  }
 0x535   :  { %v2891_v3 = vld [vmem:[#allocation7_spill] sm:$0xff] }
 0x536   :  { %2061 = vtanh.f32 %v990_v16 }
 0x537   :  { %2063 = vrcp.f32 %v985_v43 }
 0x540   :  { %v2062_v11 = vpop.eup %2061 }
 0x541   :  { %v992_v38 = vsub.f32 %v2604_v31, %v2062_v11  ;;  %v2064_v1 = vpop.eup %2063 }
 0x543   :  { %v993_v48 = vmul.f32 %v2064_v1, %v992_v38 }
 0x545   :  { %v2648_v56 = vadd.f32 %v2062_v11, %v993_v48 }
 0x547   :  { %v1001_v45 = vpack.c.bf16 %v2648_v56, %v2648_v56 }
 0x549   :  { %1035 = vmatmul.mubr.bf16.vlgmr.msra.gmra.mrb[36].mxu0 %v1001_v45  ;;  %1873 = vmatmul.mubr.bf16.vlgmr.msra.gmra.mrb[28].mxu1 %v1001_v45 }
 0x54a   :  { %1112 = vmatpush1.bf16.msra.mxu0 %v2655_v55  ;;  %1877 = vmatpush3.bf16.msra.mxu1 %v2257_v17 }
 0x54b   :  { %1113 = vmatprep.subr.bf16.mxu0 %v2662_v44  ;;  %1878 = vmatprep.subr.bf16.mxu1 %v2888_v50 }
 0x54c   :  { %1143 = vmatprep.mubr.bf16.mxu0 %v2889_v60  ;;  %1892 = vmatprep.mubr.msk.bf16.mxu1 %vm2121_vm1, %v2888_v50 }
 0x54e   :  { %1114 = vmatpush1.bf16.msra.mxu0 %v2209_v7  ;;  %1879 = vmatpush3.bf16.msra.mxu1 %v2264_v18  ;;  %v2101_v7 = vld [vmem:[%s2869_s3 + $0x4] ss:$12 sps:$4 sm:$0xff]  }
 0x54f   :  { %1115 = vmatprep.subr.bf16.mxu0 %v2216_v8  ;;  %1880 = vmatprep.subr.bf16.mxu1 %v2888_v50 }
 0x552   :  { %1116 = vmatpush1.bf16.msra.mxu0 %v2224_v10  ;;  %1881 = vmatpush3.bf16.msra.mxu1 %v2290_v22 }
 0x553   :  { %1117 = vmatprep.subr.bf16.mxu0 %v2234_v12  ;;  %1882 = vmatprep.subr.bf16.mxu1 %v2888_v50 }
 0x556   :  { %1118 = vmatpush1.bf16.msra.mxu0 %v2240_v13  ;;  %1883 = vmatpush3.bf16.msra.mxu1 %v2309_v25 }
 0x557   :  { %1119 = vmatprep.subr.bf16.mxu0 %v2250_v15  ;;  %1884 = vmatprep.subr.bf16.mxu1 %v2888_v50 }
 0x55a   :  { %1120 = vmatpush1.bf16.msra.mxu0 %v2271_v19  ;;  %1885 = vmatpush3.bf16.msra.mxu1 %v2331_v28 }
 0x55b   :  { %1121 = vmatprep.subr.bf16.mxu0 %v2278_v20  ;;  %1886 = vmatprep.subr.bf16.mxu1 %v2888_v50 }
 0x55e   :  { %1122 = vmatpush1.bf16.msra.mxu0 %v2283_v21  ;;  %1887 = vmatpush3.bf16.msra.mxu1 %v2353_v32 }
 0x55f   :  { %1123 = vmatprep.subr.bf16.mxu0 %v2301_v24  ;;  %1888 = vmatprep.subr.bf16.mxu1 %v2888_v50 }
 0x562   :  { %1124 = vmatpush1.bf16.msra.mxu0 %v2317_v26  ;;  %1889 = vmatpush3.bf16.msra.mxu1 %v2362_v33 }
 0x563   :  { %1125 = vmatprep.subr.bf16.mxu0 %v2324_v27  ;;  %1890 = vmatprep.subr.bf16.mxu1 %v2888_v50 }
 0x566   :  { %1126 = vmatpush1.bf16.msra.mxu0 %v2337_v29  ;;  %1891 = vmatpush3.bf16.msra.mxu1 %v2372_v34 }
 0x567   :  { %1220 = vmatprep.subr.bf16.mxu0 %v2101_v7  ;;  %1896 = vmatprep.subr.bf16.mxu1 %v2888_v50 }
 0x61c   :  { %v1036_v8 = vpop.f32.mrb[36].mxu0  ;;  %v1077_v10 = vpop.f32.mrb[28].mxu1 }
 0x61d   :  { %v1083_v12 = vadd.f32 %v1036_v8, %v2440_v23  ;;  %v1038_v13 = vpop.f32.mrb[37].mxu0  ;;  %v1874_v15 = vpop.f32.mrb[29].mxu1  ;;  %v1097_v61 = vadd.f32 %v2467_v40, %v1077_v10  ;;  %v2892_v10 = vld [vmem:[#allocation4_spill] sm:$0xff] }
 0x61e   :  { %v1090_v17 = vadd.f32 %v1038_v13, %v2442_v37  ;;  %v1040_v18 = vpop.f32.mrb[38].mxu0  ;;  %v1080_v19 = vpop.f32.mrb[30].mxu1 }
 0x61f   :  { %v1627_v20 = vmul.f32 -1.442695, %v1083_v12  ;;  %v1041_v21 = vpop.f32.mrb[39].mxu0  ;;  %v1875_v22 = vpop.f32.mrb[31].mxu1 }
 0x620   :  { %v1628_v24 = vmul.f32 -1.442695, %v1090_v17  ;;  %v2000_v22 = vld [vmem:[%s2873_s6 + $0x8] sm:$0xff]  }
 0x621   :  { %2065 = vpow2.f32 %v1627_v20 }
 0x622   :  { %2067 = vpow2.f32 %v1628_v24  ;;  %v2001_v24 = vld [vmem:[%s2873_s6 + $0x10] sm:$0xff]  }
 0x62b   :  { %v2066_v26 = vpop.eup %2065 }
 0x62c   :  { %v1087_v27 = vadd.f32 1.0, %v2066_v26  ;;  %v2068_v29 = vpop.eup %2067  ;;  %v2002_v26 = vld [vmem:[%s2873_s6 + $0x18] sm:$0xff]  }
 0x62d   :  { %v1094_v2 = vadd.f32 1.0, %v2068_v29  ;;  %v2004_v29 = vld [vmem:[%s2873_s6 + $0x28] sm:$0xff]  }
 0x62e   :  { %2069 = vrcp.f32 %v1087_v27  ;;  %v2003_v27 = vld [vmem:[%s2873_s6 + $0x20] sm:$0xff]  }
 0x638   :  { %v2070_v51 = vpop.eup %2069 }
 0x639   :  { %v1098_v23 = vmul.f32 %v2070_v51, %v1097_v61  ;;  %v2005_v61 = vld [vmem:[%s2873_s6 + $0x30] sm:$0xff]   ;;  %v2006_v51 = vld [vmem:[%s2873_s6 + $0x38] sm:$0xff]  }
 0x63b   :  { %v1099_v58 = vadd.f32 %v1098_v23, %v2454_v52  ;;  %v2102_v52 = vld [vmem:[%s2869_s3 + $0x8] ss:$12 sps:$4 sm:$0xff]   ;;  %v2007_v23 = vld [vmem:[%s2874_s8] sm:$0xff]  }
 0x63d   :  { %2071 = vtanh.f32 %v1099_v58  ;;  %v2008_v58 = vld [vmem:[%s2874_s8 + $0x8] sm:$0xff]  }
 0x63e   :  { %2073 = vrcp.f32 %v1094_v2  ;;  %v2009_v2 = vld [vmem:[%s2874_s8 + $0x10] sm:$0xff]  }
 0x647   :  { %v2072_v37 = vpop.eup %2071 }
 0x648   :  { %v1101_v47 = vsub.f32 %v2648_v56, %v2072_v37  ;;  %v2074_v53 = vpop.eup %2073 }
 0x64a   :  { %v1102_v31 = vmul.f32 %v2074_v53, %v1101_v47  ;;  %v2011_v47 = vld [vmem:[%s2874_s8 + $0x20] sm:$0xff]   ;;  %v2012_v53 = vld [vmem:[%s2874_s8 + $0x28] sm:$0xff]  }
 0x64c   :  { %v2704_v30 = vadd.f32 %v2072_v37, %v1102_v31  ;;  %v2010_v37 = vld [vmem:[%s2874_s8 + $0x18] sm:$0xff]  }
 0x64e   :  { %v1110_v5 = vpack.c.bf16 %v2704_v30, %v2704_v30 }
 0x650   :  { %1144 = vmatmul.mubr.bf16.vlgmr.msra.gmra.mrb[40].mxu0 %v1110_v5  ;;  %1893 = vmatmul.mubr.bf16.vlgmr.msra.gmra.mrb[32].mxu1 %v1110_v5  ;;  %v2893_v5 = vld [vmem:[#allocation8_spill] sm:$0xff] }
 0x651   :  { %1221 = vmatpush1.bf16.msra.mxu0 %v2655_v55  ;;  %1897 = vmatpush3.bf16.msra.mxu1 %v2102_v52 }
 0x652   :  { %1222 = vmatprep.subr.bf16.mxu0 %v2662_v44  ;;  %1898 = vmatprep.subr.bf16.mxu1 %v2888_v50 }
 0x653   :  { %1252 = vmatprep.mubr.bf16.mxu0 %v2889_v60  ;;  %1912 = vmatprep.mubr.msk.bf16.mxu1 %vm2121_vm1, %v2888_v50  ;;  %v2106_v60 = vld [vmem:[%s2869_s3 + $0x30] ss:$12 sps:$4 sm:$0xff]  }
 0x655   :  { %1223 = vmatpush1.bf16.msra.mxu0 %v2103_v6  ;;  %1899 = vmatpush3.bf16.msra.mxu1 %v2104_v62 }
 0x656   :  { %1224 = vmatprep.subr.bf16.mxu0 %v2105_v39  ;;  %1900 = vmatprep.subr.bf16.mxu1 %v2888_v50 }
 0x659   :  { %1225 = vmatpush1.bf16.msra.mxu0 %v2106_v60  ;;  %1901 = vmatpush3.bf16.msra.mxu1 %v2107_v49 }
 0x65a   :  { %1226 = vmatprep.subr.bf16.mxu0 %v2108_v0  ;;  %1902 = vmatprep.subr.bf16.mxu1 %v2888_v50 }
 0x65d   :  { %1227 = vmatpush1.bf16.msra.mxu0 %v2109_v59  ;;  %1903 = vmatpush3.bf16.msra.mxu1 %v2309_v25  ;;  %v2113_v25 = vld [vmem:[%s2869_s3 + $0x78] ss:$12 sps:$4 sm:$0xff]  }
 0x65e   :  { %1228 = vmatprep.subr.bf16.mxu0 %v2110_v46  ;;  %1904 = vmatprep.subr.bf16.mxu1 %v2888_v50 }
 0x661   :  { %1229 = vmatpush1.bf16.msra.mxu0 %v2111_v9  ;;  %1905 = vmatpush3.bf16.msra.mxu1 %v2331_v28  ;;  %v2115_v28 = vld [vmem:[%s2869_s3 + $0x90] ss:$12 sps:$4 sm:$0xff]  }
 0x662   :  { %1230 = vmatprep.subr.bf16.mxu0 %v2112_v36  ;;  %1906 = vmatprep.subr.bf16.mxu1 %v2888_v50 }
 0x665   :  { %1231 = vmatpush1.bf16.msra.mxu0 %v2113_v25  ;;  %1907 = vmatpush3.bf16.msra.mxu1 %v2353_v32  ;;  %v2117_v32 = vld [vmem:[%s2869_s3 + $0xa8] ss:$12 sps:$4 sm:$0xff]  }
 0x666   :  { %1232 = vmatprep.subr.bf16.mxu0 %v2114_v54  ;;  %1908 = vmatprep.subr.bf16.mxu1 %v2888_v50 }
 0x669   :  { %1233 = vmatpush1.bf16.msra.mxu0 %v2115_v28  ;;  %1909 = vmatpush3.bf16.msra.mxu1 %v2362_v33  ;;  %v2118_v28 = vld [vmem:[%s2872_s5] ss:$0 sm:$0xff] }
 0x66a   :  { %1234 = vmatprep.subr.bf16.mxu0 %v2116_v57  ;;  %1910 = vmatprep.subr.bf16.mxu1 %v2888_v50 }
 0x66d   :  { %1235 = vmatpush1.bf16.msra.mxu0 %v2117_v32  ;;  %1911 = vmatpush3.bf16.msra.mxu1 %v2372_v34 }
 0x66e   :  { %1916 = vmatprep.subr.bf16.mxu0 %v2888_v50  ;;  %1936 = vmatprep.subr.bf16.mxu1 %v2888_v50 }
 0x723   :  { %v1145_v63 = vpop.f32.mrb[40].mxu0  ;;  %v1186_v33 = vpop.f32.mrb[32].mxu1 }
 0x724   :  { %v1192_v4 = vadd.f32 %v1145_v63, %v2890_v35  ;;  %v1147_v41 = vpop.f32.mrb[41].mxu0  ;;  %v1894_v42 = vpop.f32.mrb[33].mxu1  ;;  %v1206_v44 = vadd.f32 %v2467_v40, %v1186_v33  ;;  %v1999_v40 = vld [vmem:[%s2873_s6] sm:$0xff]  }
 0x725   :  { %v1199_v16 = vadd.f32 %v1147_v41, %v2891_v3  ;;  %v1149_v43 = vpop.f32.mrb[42].mxu0  ;;  %v1189_v11 = vpop.f32.mrb[34].mxu1 }
 0x726   :  { %v1629_v38 = vmul.f32 -1.442695, %v1192_v4  ;;  %v1150_v1 = vpop.f32.mrb[43].mxu0  ;;  %v1895_v48 = vpop.f32.mrb[35].mxu1  ;;  %v2013_v11 = vld [vmem:[%s2874_s8 + $0x30] sm:$0xff]  }
 0x727   :  { %v1630_v56 = vmul.f32 -1.442695, %v1199_v16  ;;  %v1633_v1 = vld [vmem:[%s2875_s7] ss:$0 sm:$0xff] }
 0x728   :  { %2075 = vpow2.f32 %v1629_v38  ;;  %v2014_v38 = vld [vmem:[%s2874_s8 + $0x38] sm:$0xff]  }
 0x729   :  { %2077 = vpow2.f32 %v1630_v56 }
 0x732   :  { %v2076_v34 = vpop.eup %2075 }
 0x733   :  { %v1196_v45 = vadd.f32 1.0, %v2076_v34  ;;  %v2078_v55 = vpop.eup %2077 }
 0x734   :  { %v1203_v13 = vadd.f32 1.0, %v2078_v55 }
 0x735   :  { %2079 = vrcp.f32 %v1196_v45 }
 0x73f   :  { %v2080_v7 = vpop.eup %2079 }
 0x740   :  { %v1207_v8 = vmul.f32 %v2080_v7, %v1206_v44 }
 0x742   :  { %v1208_v12 = vadd.f32 %v1207_v8, %v2892_v10  ;;  %v2895_v8 = vlaneseq }
 0x744   :  { %2081 = vtanh.f32 %v1208_v12  ;;  %v1553_v10 = vand.u32 127, %v2895_v8 }
 0x745   :  { %2083 = vrcp.f32 %v1203_v13 }
 0x746   :  { %vm1554_vm2 = vcmp.lt.s32.totalorder %v1553_v10, 4 }
 0x74e   :  { %v2082_v15 = vpop.eup %2081 }
 0x74f   :  { %v1210_v17 = vsub.f32 %v2704_v30, %v2082_v15  ;;  %v2084_v18 = vpop.eup %2083 }
 0x751   :  { %v1211_v19 = vmul.f32 %v2084_v18, %v1210_v17 }
 0x753   :  { %v2780_v20 = vadd.f32 %v2082_v15, %v1211_v19 }
 0x755   :  { %v1219_v21 = vpack.c.bf16 %v2780_v20, %v2780_v20 }
 0x757   :  { %1253 = vmatmul.mubr.bf16.vlgmr.msra.gmra.mrb[44].mxu0 %v1219_v21  ;;  %1913 = vmatmul.mubr.bf16.vlgmr.msra.gmra.mrb[36].mxu1 %v1219_v21 }
 0x758   :  { %1932 = vmatprep.mubr.msk.bf16.mxu0 %vm2121_vm1, %v2888_v50  ;;  %1952 = vmatprep.mubr.msk.bf16.mxu1 %vm2121_vm1, %v2888_v50 }
 0x759   :  { %1917 = vmatpush3.bf16.msra.mxu0 %v1999_v40  ;;  %1937 = vmatpush3.bf16.msra.mxu1 %v2007_v23 }
 0x75a   :  { %1918 = vmatprep.subr.bf16.mxu0 %v2888_v50  ;;  %1938 = vmatprep.subr.bf16.mxu1 %v2888_v50 }
 0x75d   :  { %1919 = vmatpush3.bf16.msra.mxu0 %v2000_v22  ;;  %1939 = vmatpush3.bf16.msra.mxu1 %v2008_v58 }
 0x75e   :  { %1920 = vmatprep.subr.bf16.mxu0 %v2888_v50  ;;  %1940 = vmatprep.subr.bf16.mxu1 %v2888_v50 }
 0x761   :  { %1921 = vmatpush3.bf16.msra.mxu0 %v2001_v24  ;;  %1941 = vmatpush3.bf16.msra.mxu1 %v2009_v2 }
 0x762   :  { %1922 = vmatprep.subr.bf16.mxu0 %v2888_v50  ;;  %1942 = vmatprep.subr.bf16.mxu1 %v2888_v50 }
 0x765   :  { %1923 = vmatpush3.bf16.msra.mxu0 %v2002_v26  ;;  %1943 = vmatpush3.bf16.msra.mxu1 %v2010_v37 }
 0x766   :  { %1924 = vmatprep.subr.bf16.mxu0 %v2888_v50  ;;  %1944 = vmatprep.subr.bf16.mxu1 %v2888_v50 }
 0x769   :  { %1925 = vmatpush3.bf16.msra.mxu0 %v2003_v27  ;;  %1945 = vmatpush3.bf16.msra.mxu1 %v2011_v47 }
 0x76a   :  { %1926 = vmatprep.subr.bf16.mxu0 %v2888_v50  ;;  %1946 = vmatprep.subr.bf16.mxu1 %v2888_v50 }
 0x76d   :  { %1927 = vmatpush3.bf16.msra.mxu0 %v2004_v29  ;;  %1947 = vmatpush3.bf16.msra.mxu1 %v2012_v53 }
 0x76e   :  { %1928 = vmatprep.subr.bf16.mxu0 %v2888_v50  ;;  %1948 = vmatprep.subr.bf16.mxu1 %v2888_v50 }
 0x771   :  { %1929 = vmatpush3.bf16.msra.mxu0 %v2005_v61  ;;  %1949 = vmatpush3.bf16.msra.mxu1 %v2013_v11 }
 0x772   :  { %1930 = vmatprep.subr.bf16.mxu0 %v2888_v50  ;;  %1950 = vmatprep.subr.bf16.mxu1 %v2888_v50  ;;  %v1642_v50 = vld [vmem:[%s2876_s9] ss:$0 sm:$0xff] }
 0x775   :  { %1931 = vmatpush3.bf16.msra.mxu0 %v2006_v51  ;;  %1951 = vmatpush3.bf16.msra.mxu1 %v2014_v38 }
 0x82a   :  { %v1254_v31 = vpop.f32.mrb[44].mxu0  ;;  %v1295_v30 = vpop.f32.mrb[36].mxu1 }
 0x82b   :  { %v1301_v52 = vadd.f32 %v1254_v31, %v2893_v5  ;;  %v1256_v6 = vpop.f32.mrb[45].mxu0  ;;  %v1914_v62 = vpop.f32.mrb[37].mxu1  ;;  %v1315_v57 = vadd.f32 %v2118_v28, %v1295_v30 }
 0x82c   :  { %v1308_v39 = vadd.f32 %v1256_v6, %v2462_v14  ;;  %v1258_v60 = vpop.f32.mrb[46].mxu0  ;;  %v1298_v49 = vpop.f32.mrb[38].mxu1  ;;  %v2894_v14 = vld [vmem:[#allocation5_spill] sm:$0xff] }
 0x82d   :  { %v1631_v0 = vmul.f32 -1.442695, %v1301_v52  ;;  %v1259_v59 = vpop.f32.mrb[47].mxu0  ;;  %v1915_v46 = vpop.f32.mrb[39].mxu1 }
 0x82e   :  { %v1632_v9 = vmul.f32 -1.442695, %v1308_v39 }
 0x82f   :  { %2085 = vpow2.f32 %v1631_v0 }
 0x830   :  { %2087 = vpow2.f32 %v1632_v9 }
 0x839   :  { %v2086_v36 = vpop.eup %2085 }
 0x83a   :  { %v1305_v25 = vadd.f32 1.0, %v2086_v36  ;;  %v2088_v54 = vpop.eup %2087 }
 0x83b   :  { %v1312_v35 = vadd.f32 1.0, %v2088_v54 }
 0x83c   :  { %2089 = vrcp.f32 %v1305_v25 }
 0x846   :  { %v2090_v32 = vpop.eup %2089 }
 0x847   :  { %v1316_v63 = vmul.f32 %v2090_v32, %v1315_v57 }
 0x849   :  { %v1317_v33 = vadd.f32 %v1316_v63, %v2894_v14 }
 0x84b   :  { %2091 = vtanh.f32 %v1317_v33 }
 0x84c   :  { %2093 = vrcp.f32 %v1312_v35 }
 0x855   :  { %v2092_v4 = vpop.eup %2091 }
 0x856   :  { %v1319_v41 = vsub.f32 %v2780_v20, %v2092_v4  ;;  %v2094_v42 = vpop.eup %2093 }
 0x858   :  { %v1320_v3 = vmul.f32 %v2094_v42, %v1319_v41 }
 0x85a   :  { %v1321_v16 = vadd.f32 %v2092_v4, %v1320_v3 }
 0x85c   :  { %v1326_v43 = vpack.c.bf16 %v1321_v16, %v1321_v16 }
 0x85e   :  { %1933 = vmatmul.mubr.bf16.vlgmr.msra.gmra.mrb[48].mxu0 %v1326_v43 }
 0x931   :  { %v1432_v48 = vpop.f32.mrb[48].mxu0 }
 0x932   :  { %v1433_v56 = vadd.f32 %v1633_v1, %v1432_v48  ;;  %v1934_v34 = vpop.f32.mrb[49].mxu0 }
 0x933   :  { %v1435_v45 = vpop.f32.mrb[50].mxu0 }
 0x934   :  { %v1438_v55 = vmax.f32 %v1433_v56, 0.0  ;;  %v1935_v44 = vpop.f32.mrb[51].mxu0 }
 0x936   :  { %v1439_v7 = vpack.c.bf16 %v1438_v55, %v1438_v55 }
 0x938   :  { %1953 = vmatmul.mubr.bf16.vlgmr.msra.gmra.mrb[40].mxu1 %v1439_v7 }
 0xa0b   :  { %v1545_v12 = vpop.f32.mrb[40].mxu1 }
 0xa0c   :  { %v1546_v13 = vadd.f32 %v1642_v50, %v1545_v12  ;;  %v1954_v15 = vpop.f32.mrb[41].mxu1 }
 0xa0d   :  { %v1548_v17 = vpop.f32.mrb[42].mxu1 }
 0xa0e   :  { %v1551_v18 = vmax.f32 %v1546_v13, 0.0  ;;  %v1955_v19 = vpop.f32.mrb[43].mxu1 }
 0xa10   :  { %v1555_v20 = vsel %vm1554_vm2, %v1551_v18, -1e+30 }
 0xa11   :  { %1556 = vmax.xlane.f32.xlu0 %v1555_v20 }
 0xa9e   :  { %v1557_v21 = vpop.xlane.xlu0 %1556 }
 0xa9f   :  { %v1558_v40 = vsub.f32 %v1555_v20, %v1557_v21 }
 0xaa1   :  { %v1559_v22 = vmul.f32 1.442695, %v1558_v40 }
 0xaa3   :  { %2095 = vpow2.f32 %v1559_v22 }
 0xaad   :  { %v2096_v24 = vpop.eup %2095 }
 0xaae   :  { %1561 = vadd.xlane.f32.xlu0 %v2096_v24 }
 0xb3b   :  { %v1562_v26 = vpop.xlane.xlu0 %1561 }
 0xb3c   :  { %2097 = vrcp.f32 %v1562_v26 }
 0xb46   :  { %v2098_v27 = vpop.eup %2097 }
 0xb47   :  { %v1564_v29 = vmul.f32 %v2098_v27, %v2096_v24 }
 0xb49   :  { %1565 = vst [vmem:[%s2877_s10] sm:$0xff] %v1564_v29 }

</bundles_post_ra>
